<compile_context>
chip_gen: v6e
topology: v6e:2x2x1
jax: 0.10.0
libtpu: 0.0.40
codegen_flags: <defaults>
</compile_context>

<pallas_src>
import jax
import jax.numpy as jnp
from jax.experimental import pallas as pl
from jax.experimental.pallas import tpu as pltpu

H, W_SP, CIN, COUT = 28, 28, 64, 128
KTAPS = 9
K = KTAPS * CIN              # 576 contraction length (full-extent block, no pad)
M = H * W_SP                 # 784 output pixels

# TODO(synk): the torch module picks shift_direction randomly in {-1, +1} at
# __init__; we fix it deterministically here (both values are supported and
# verified below).
SHIFT = 1


def gemm_kernel(p_ref, w_ref, o_ref):
    # Single MXU GEMM: (784, 576) bf16 @ (576, 128) bf16 -> (784, 128) f32.
    o_ref[...] = jnp.dot(p_ref[...], w_ref[...],
                         preferred_element_type=jnp.float32)


def conv3x3_as_gemm(patches, w_flat):
    return pl.pallas_call(
        gemm_kernel,
        out_shape=jax.ShapeDtypeStruct((M, COUT), jnp.float32),
        grid=(1,),
        in_specs=[
            pl.BlockSpec((M, K), lambda i: (0, 0)),       # full patch matrix
            pl.BlockSpec((K, COUT), lambda i: (0, 0)),    # full folded weight
        ],
        out_specs=pl.BlockSpec((M, COUT), lambda i: (0, 0)),
        compiler_params=pltpu.CompilerParams(
            dimension_semantics=("arbitrary",)),
        cost_estimate=pl.CostEstimate(
            flops=2 * M * K * COUT,
            bytes_accessed=M * K * 2 + K * COUT * 2 + M * COUT * 4,
            transcendentals=0),
    )(patches, w_flat)


def forward(x, w1, w2, shift=SHIFT):
    """Equivalent of kernel_generated_1.forward. x: (1, 64, 28, 28) NCHW f32."""
    # ---- fold W1 (128,32,3,3,2) and W2 (64,3,2) into one 3x3 weight (tiny) ----
    w1e = jnp.repeat(w1, 2, axis=1)                       # (128, 64, 3, 3, 2)
    weff = jnp.einsum('ockji,cki->ockj', w1e, w2)         # (128, 64, 3, 3)
    # Row index of the flattened weight = (kh*3 + kw)*64 + c (matches im2col below).
    w_flat = jnp.transpose(weff, (2, 3, 1, 0)).reshape(K, COUT).astype(jnp.bfloat16)

    # ---- bf16 first, then roll / NCHW->HWC / zero pad / im2col (9 slices) ----
    xb = x.astype(jnp.bfloat16)
    xs = jnp.roll(xb, (shift, shift), axis=(2, 3))
    x_hwc = jnp.transpose(xs[0], (1, 2, 0))               # (28, 28, 64) bf16
    xp = jnp.pad(x_hwc, ((1, 1), (1, 1), (0, 0)))         # (30, 30, 64) bf16
    cols = [xp[kh:kh + H, kw:kw + W_SP, :]                # tap order t = kh*3 + kw
            for kh in range(3) for kw in range(3)]
    patches = jnp.concatenate(cols, axis=-1).reshape(M, K)  # (784, 576) bf16

    # ---- hot path: one big GEMM on the MXU ----
    y_flat = conv3x3_as_gemm(patches, w_flat)             # (784, 128) f32
    y_hwc = y_flat.reshape(H, W_SP, COUT)
    return jnp.transpose(y_hwc, (2, 0, 1))[None]          # (1, 128, 28, 28) NCHW


def torch_style_reference(x, w1, w2, shift=SHIFT):
    # Direct jnp transcription of the PyTorch forward (f32), verification only.
    t3 = jnp.roll(x, shift, axis=2).reshape(1, 64, 28, 28)
    t3p = jnp.pad(t3, ((0, 0), (0, 0), (1, 1), (0, 0)))
    t3u = jnp.stack([t3p[:, :, k:k + 28, :] for k in range(3)], axis=2)  # (1,64,3,28,28)
    t4 = jnp.einsum('ljkmn,jki->ljkmni', t3u, w2)
    t5 = t4.reshape(1, 32, 2, 3, 28, 28, 2).sum(axis=2)
    t6 = jnp.roll(t5, shift, axis=4).reshape(1, 2688, 28, 2)
    t6p = jnp.pad(t6, ((0, 0), (0, 0), (1, 1), (0, 0)))
    t6u = jnp.stack([t6p[:, :, k:k + 28, :] for k in range(3)], axis=2)   # (1,2688,3,28,2)
    t6u = t6u.reshape(1, 32, 3, 28, 3, 28, 2)
    return jnp.einsum('nlkojpm,ilkjm->niop', t6u, w1)


if __name__ == "__main__":
    key = jax.random.PRNGKey(0)
    kx, k1, k2 = jax.random.split(key, 3)
    # Shapes are fixed by the module's hard-coded reshapes: x must be (1,64,28,28).
    x = jax.random.normal(kx, (1, 64, 28, 28), jnp.float32)
    w1 = jax.random.normal(k1, (128, 32, 3, 3, 2), jnp.float32)   # self.weights[0]
    w2 = jax.random.normal(k2, (64, 3, 2), jnp.float32)           # self.weights[1]

    jfwd = jax.jit(forward, static_argnums=3)
    for s in (1, -1):   # both possible shift_direction values of the torch module
        y = jax.block_until_ready(jfwd(x, w1, w2, s))
        assert y.shape == (1, 128, 28, 28)

        y_ref = torch_style_reference(x, w1, w2, s)
        # bf16 MXU operands (f32 accumulation) vs. the f32 reference: check error
        # relative to the output scale (per-element values have std ~ sqrt(2*576) ~ 34).
        rel_fro = float(jnp.linalg.norm(y - y_ref) / jnp.linalg.norm(y_ref))
        max_err = float(jnp.max(jnp.abs(y - y_ref)))
        scale = float(jnp.max(jnp.abs(y_ref)))
        assert rel_fro < 1e-2, (s, rel_fro)
        assert max_err < 1e-2 * scale, (s, max_err, scale)

    print("KERNEL_OK")
</pallas_src>

<mosaic_0001>
module attributes {stable_mosaic.version = 11 : i64} {
  func.func @gemm_kernel(%arg0: i32, %arg1: memref<784x576xbf16, #tpu.memory_space<vmem>>, %arg2: memref<576x128xbf16, #tpu.memory_space<vmem>>, %arg3: memref<784x128xf32, #tpu.memory_space<vmem>>) attributes {dimension_semantics = [#tpu.dimension_semantics<arbitrary>], iteration_bounds = array<i64: 1>, scalar_prefetch = 0 : i64, scratch_operands = 0 : i64, tpu.core_type = #tpu.core_type<tc>, window_params = [{pipeline_mode = #tpu.pipeline_mode<synchronous>, transform_indices = @transform_0, window_bounds = array<i64: 784, 576>}, {pipeline_mode = #tpu.pipeline_mode<synchronous>, transform_indices = @transform_1, window_bounds = array<i64: 576, 128>}, {pipeline_mode = #tpu.pipeline_mode<synchronous>, transform_indices = @transform_2, window_bounds = array<i64: 784, 128>}]} {
    %c0 = arith.constant 0 : index
    %c0_0 = arith.constant 0 : index
    %0 = vector.load %arg1[%c0, %c0_0] : memref<784x576xbf16, #tpu.memory_space<vmem>>, vector<784x576xbf16>
    %c0_1 = arith.constant 0 : index
    %c0_2 = arith.constant 0 : index
    %1 = vector.load %arg2[%c0_1, %c0_2] : memref<576x128xbf16, #tpu.memory_space<vmem>>, vector<576x128xbf16>
    %cst = arith.constant dense<0.000000e+00> : vector<784x128xf32>
    %2 = tpu.matmul %0, %1, %cst {dimension_numbers = #tpu.dot_dimension_numbers<[1], [0], [0], [1], [0, 0, 1, 1], [], []>} : vector<784x576xbf16>, vector<576x128xbf16>, vector<784x128xf32> -> vector<784x128xf32>
    %c0_3 = arith.constant 0 : index
    %c0_4 = arith.constant 0 : index
    %3 = vector.load %arg3[%c0_3, %c0_4] : memref<784x128xf32, #tpu.memory_space<vmem>>, vector<784x128xf32>
    tpu.vector_store %arg3[%c0_3, %c0_4], %2 {strides = array<i32>} : memref<784x128xf32, #tpu.memory_space<vmem>>, vector<784x128xf32>,
    return
  }
  func.func @transform_0(%arg0: i32) -> (i32, i32) {
    %c0_i32 = arith.constant 0 : i32
    %c0_i32_0 = arith.constant 0 : i32
    %c0_i32_1 = arith.constant 0 : i32
    return %c0_i32, %c0_i32_0 : i32, i32
  }
  func.func @transform_1(%arg0: i32) -> (i32, i32) {
    %c0_i32 = arith.constant 0 : i32
    %c0_i32_0 = arith.constant 0 : i32
    %c0_i32_1 = arith.constant 0 : i32
    return %c0_i32, %c0_i32_0 : i32, i32
  }
  func.func @transform_2(%arg0: i32) -> (i32, i32) {
    %c0_i32 = arith.constant 0 : i32
    %c0_i32_0 = arith.constant 0 : i32
    %c0_i32_1 = arith.constant 0 : i32
    return %c0_i32, %c0_i32_0 : i32, i32
  }
}

</mosaic_0001>

<bundles_post_ra>
// kernel: forward.1
= control target key start
LH: loop header
LB: loop body
LE: loop exit
PB: predicated region body
PF: predicated region fallthrough
CT: control target
= control target key end

     0   :  { %v4345_v0 = vmov 0   ;;  %v5996_v24 = vmov 0.0   ;;  %vm4347_vm0 = vmmov 0   ;;  %vm1819_vm1 = vcmask 523264   ;;  %s5993_s1 = inlined_call_operand.vmem [shape: bf16[576,128], index: 1, kind: input, shape index: {}]   ;;  %s5994_s0 = inlined_call_operand.vmem [shape: bf16[784,576], index: 0, kind: input, shape index: {}]   ;;  %s5995_s2 = inlined_call_operand.vmem [shape: f32[784,128], index: 2, kind: output, shape index: {}]  }
   0x1   :  { %1967 = vmatprep.subr.bf16.mxu0 %v4345_v0  ;;  %3931 = vmatprep.subr.bf16.mxu1 %v4345_v0  ;;  %v3966_v1 = vld [vmem:[%s5993_s1 + $0x38] sm:$0xff]   ;;  %v3967_v2 = vld [vmem:[%s5993_s1 + $0x30] sm:$0xff]   ;;  %v3968_v3 = vld [vmem:[%s5993_s1 + $0x28] sm:$0xff]  }
   0x2   :  { %1968 = vmatpush1.bf16.msra.mxu0 %v3966_v1  ;;  %3947 = vmatpush1.bf16.msra.mxu1 %v3966_v1  ;;  %v3969_v4 = vld [vmem:[%s5993_s1 + $0x20] sm:$0xff]   ;;  %v3970_v5 = vld [vmem:[%s5993_s1 + $0x18] sm:$0xff]   ;;  %v3971_v7 = vld [vmem:[%s5993_s1 + $0x10] sm:$0xff]  }
   0x3   :  { %1969 = vmatprep.subr.bf16.mxu0 %v4345_v0  ;;  %3932 = vmatprep.subr.bf16.mxu1 %v4345_v0  ;;  %v3984_v6 = vld [vmem:[%s5994_s0 + $0x4] ss:$20 sps:$4 sm:$0xff]   ;;  %v3987_v8 = vld [vmem:[%s5994_s0 + $0x3ec] ss:$20 sps:$4 sm:$0xff]   ;;  %v3975_v12 = vld [vmem:[%s5993_s1 + $0x70] sm:$0xff]  }
   0x4   :  { %1999 = vmatprep.mubr.bf16.mxu0 %v3984_v6  ;;  %2199 = vmatprep.mubr.bf16.mxu1 %v3987_v8  ;;  %v3972_v9 = vld [vmem:[%s5993_s1 + $0x8] sm:$0xff]   ;;  %v3973_v10 = vld [vmem:[%s5993_s1] sm:$0xff]   ;;  %v3974_v11 = vld [vmem:[%s5993_s1 + $0x78] sm:$0xff]  }
   0x5   :  { %v3976_v13 = vld [vmem:[%s5993_s1 + $0x68] sm:$0xff]   ;;  %v3977_v14 = vld [vmem:[%s5993_s1 + $0x60] sm:$0xff]   ;;  %v3978_v15 = vld [vmem:[%s5993_s1 + $0x58] sm:$0xff]  }
   0x6   :  { %1970 = vmatpush1.bf16.msra.mxu0 %v3967_v2  ;;  %3948 = vmatpush1.bf16.msra.mxu1 %v3967_v2  ;;  %v3979_v16 = vld [vmem:[%s5993_s1 + $0x50] sm:$0xff]   ;;  %v3980_v17 = vld [vmem:[%s5993_s1 + $0x48] sm:$0xff]   ;;  %v3981_v18 = vld [vmem:[%s5993_s1 + $0x40] sm:$0xff]  }
   0x7   :  { %1971 = vmatprep.subr.bf16.mxu0 %v4345_v0  ;;  %3933 = vmatprep.subr.bf16.mxu1 %v4345_v0  ;;  %v3982_v19 = vld [vmem:[%s5994_s0] ss:$20 sps:$4 sm:$0xff]   ;;  %v3985_v20 = vld [vmem:[%s5994_s0 + $0x3e8] ss:$20 sps:$4 sm:$0xff]   ;;  %v3995_v29 = vld [vmem:[%s5994_s0 + $0x410] ss:$20 sps:$4 sm:$0xff]  }
   0x8   :  { %v3988_v21 = vld [vmem:[%s5993_s1 + $0x118] sm:$0xff]   ;;  %v3989_v22 = vld [vmem:[%s5994_s0 + $0x2c] ss:$20 sps:$4 sm:$0xff]   ;;  %v3991_v23 = vld [vmem:[%s5994_s0 + $0x414] ss:$20 sps:$4 sm:$0xff]  }
   0x9   :  { %v3993_v25 = vld [vmem:[%s5993_s1 + $0xb8] sm:$0xff]   ;;  %v4029_v26 = vld [vmem:[%s5993_s1 + $0x110] sm:$0xff]   ;;  %v4013_v32 = vld [vmem:[%s5993_s1 + $0xa8] sm:$0xff]  }
   0xa   :  { %1972 = vmatpush1.bf16.msra.mxu0 %v3968_v3  ;;  %3949 = vmatpush1.bf16.msra.mxu1 %v3968_v3  ;;  %v3994_v27 = vld [vmem:[%s5994_s0 + $0x28] ss:$20 sps:$4 sm:$0xff]   ;;  %v4002_v28 = vld [vmem:[%s5993_s1 + $0xb0] sm:$0xff]   ;;  %v4022_v34 = vld [vmem:[%s5993_s1 + $0xa0] sm:$0xff]  }
   0xb   :  { %1973 = vmatprep.subr.bf16.mxu0 %v4345_v0  ;;  %3934 = vmatprep.subr.bf16.mxu1 %v4345_v0  ;;  %v3996_v30 = vld [vmem:[%s5994_s0 + $0x54] ss:$20 sps:$4 sm:$0xff]   ;;  %v3998_v31 = vld [vmem:[%s5994_s0 + $0x43c] ss:$20 sps:$4 sm:$0xff]   ;;  %v4001_v36 = vld [vmem:[%s5994_s0 + $0x438] ss:$20 sps:$4 sm:$0xff]  }
   0xc   :  { %v4070_v33 = vld [vmem:[%s5993_s1 + $0x108] sm:$0xff]   ;;  %v4000_v35 = vld [vmem:[%s5994_s0 + $0x50] ss:$20 sps:$4 sm:$0xff]   ;;  %v4034_v39 = vld [vmem:[%s5993_s1 + $0x98] sm:$0xff]  }
   0xd   :  { %v4003_v37 = vld [vmem:[%s5994_s0 + $0x7c] ss:$20 sps:$4 sm:$0xff]   ;;  %v4005_v38 = vld [vmem:[%s5994_s0 + $0x464] ss:$20 sps:$4 sm:$0xff]   ;;  %v4008_v41 = vld [vmem:[%s5994_s0 + $0x460] ss:$20 sps:$4 sm:$0xff]  }
   0xe   :  { %1974 = vmatpush1.bf16.msra.mxu0 %v3969_v4  ;;  %3950 = vmatpush1.bf16.msra.mxu1 %v3969_v4  ;;  %v4007_v40 = vld [vmem:[%s5994_s0 + $0x78] ss:$20 sps:$4 sm:$0xff]   ;;  %v4043_v42 = vld [vmem:[%s5993_s1 + $0x90] sm:$0xff]   ;;  %v4116_v45 = vld [vmem:[%s5993_s1 + $0x100] sm:$0xff]  }
   0xf   :  { %1975 = vmatprep.subr.bf16.mxu0 %v4345_v0  ;;  %3935 = vmatprep.subr.bf16.mxu1 %v4345_v0  ;;  %v4009_v43 = vld [vmem:[%s5994_s0 + $0xa4] ss:$20 sps:$4 sm:$0xff]   ;;  %v4011_v44 = vld [vmem:[%s5994_s0 + $0x48c] ss:$20 sps:$4 sm:$0xff]   ;;  %v4015_v49 = vld [vmem:[%s5994_s0 + $0x488] ss:$20 sps:$4 sm:$0xff]  }
  0x10   :  { %v4054_v46 = vld [vmem:[%s5993_s1 + $0x88] sm:$0xff]   ;;  %v4063_v47 = vld [vmem:[%s5993_s1 + $0x80] sm:$0xff]   ;;  %v4075_v52 = vld [vmem:[%s5993_s1 + $0xf8] sm:$0xff]  }
  0x11   :  { %v4014_v48 = vld [vmem:[%s5994_s0 + $0xa0] ss:$20 sps:$4 sm:$0xff]   ;;  %v4020_v54 = vld [vmem:[%s5994_s0 + $0xc8] ss:$20 sps:$4 sm:$0xff]   ;;  %v4021_v55 = vld [vmem:[%s5994_s0 + $0x4b0] ss:$20 sps:$4 sm:$0xff]  }
  0x12   :  { %1976 = vmatpush1.bf16.msra.mxu0 %v3970_v5  ;;  %3951 = vmatpush1.bf16.msra.mxu1 %v3970_v5  ;;  %v4016_v50 = vld [vmem:[%s5994_s0 + $0xcc] ss:$20 sps:$4 sm:$0xff]   ;;  %v4018_v51 = vld [vmem:[%s5994_s0 + $0x4b4] ss:$20 sps:$4 sm:$0xff]   ;;  %v4025_v57 = vld [vmem:[%s5994_s0 + $0x4dc] ss:$20 sps:$4 sm:$0xff]  }
  0x13   :  { %1977 = vmatprep.subr.bf16.mxu0 %v4345_v0  ;;  %3936 = vmatprep.subr.bf16.mxu1 %v4345_v0  ;;  %v4084_v53 = vld [vmem:[%s5993_s1 + $0xf0] sm:$0xff]   ;;  %v4095_v58 = vld [vmem:[%s5993_s1 + $0xe8] sm:$0xff]   ;;  %v4104_v59 = vld [vmem:[%s5993_s1 + $0xe0] sm:$0xff]  }
  0x14   :  { %v4023_v56 = vld [vmem:[%s5994_s0 + $0xf4] ss:$20 sps:$4 sm:$0xff]   ;;  %v4027_v60 = vld [vmem:[%s5994_s0 + $0xf0] ss:$20 sps:$4 sm:$0xff]   ;;  %v4028_v61 = vld [vmem:[%s5994_s0 + $0x4d8] ss:$20 sps:$4 sm:$0xff]  }
  0x15   :  { %v4030_v62 = vld [vmem:[%s5994_s0 + $0x11c] ss:$20 sps:$4 sm:$0xff]   ;;  %v4032_v63 = vld [vmem:[%s5994_s0 + $0x504] ss:$20 sps:$4 sm:$0xff]   ;;  %v4036_v4 = vld [vmem:[%s5994_s0 + $0x500] ss:$20 sps:$4 sm:$0xff]  }
  0x16   :  { %1978 = vmatpush1.bf16.msra.mxu0 %v3971_v7  ;;  %3952 = vmatpush1.bf16.msra.mxu1 %v3971_v7  ;;  %v4115_v1 = vld [vmem:[%s5993_s1 + $0xd8] sm:$0xff]   ;;  %v4125_v2 = vld [vmem:[%s5993_s1 + $0xd0] sm:$0xff]   ;;  %v4039_v6 = vld [vmem:[%s5994_s0 + $0x52c] ss:$20 sps:$4 sm:$0xff]  }
  0x17   :  { %1979 = vmatprep.subr.bf16.mxu0 %v4345_v0  ;;  %3937 = vmatprep.subr.bf16.mxu1 %v4345_v0  ;;  %v4035_v3 = vld [vmem:[%s5994_s0 + $0x118] ss:$20 sps:$4 sm:$0xff]   ;;  %v4145_v8 = vld [vmem:[%s5993_s1 + $0xc0] sm:$0xff]  }
  0x18   :  { %v4037_v5 = vld [vmem:[%s5994_s0 + $0x144] ss:$20 sps:$4 sm:$0xff]   ;;  %v4136_v7 = vld [vmem:[%s5993_s1 + $0xc8] sm:$0xff]  }
  0x1a   :  { %1980 = vmatpush1.bf16.msra.mxu0 %v3972_v9  ;;  %3953 = vmatpush1.bf16.msra.mxu1 %v3972_v9  ;;  %v4041_v9 = vld [vmem:[%s5994_s0 + $0x140] ss:$20 sps:$4 sm:$0xff]  }
  0x1b   :  { %1981 = vmatprep.subr.bf16.mxu0 %v4345_v0  ;;  %3938 = vmatprep.subr.bf16.mxu1 %v4345_v0 }
  0x1e   :  { %1982 = vmatpush1.bf16.msra.mxu0 %v3973_v10  ;;  %3954 = vmatpush1.bf16.msra.mxu1 %v3973_v10  ;;  %v4042_v10 = vld [vmem:[%s5994_s0 + $0x528] ss:$20 sps:$4 sm:$0xff]  }
  0x1f   :  { %1983 = vmatprep.subr.bf16.mxu0 %v4345_v0  ;;  %3939 = vmatprep.subr.bf16.mxu1 %v4345_v0 }
  0x22   :  { %1984 = vmatpush2.bf16.msra.mxu0 %v3974_v11  ;;  %3955 = vmatpush2.bf16.msra.mxu1 %v3974_v11  ;;  %v4044_v11 = vld [vmem:[%s5994_s0 + $0x16c] ss:$20 sps:$4 sm:$0xff]  }
  0x23   :  { %1985 = vmatprep.subr.bf16.mxu0 %v4345_v0  ;;  %3940 = vmatprep.subr.bf16.mxu1 %v4345_v0 }
  0x26   :  { %1986 = vmatpush2.bf16.msra.mxu0 %v3975_v12  ;;  %3956 = vmatpush2.bf16.msra.mxu1 %v3975_v12  ;;  %v4046_v12 = vld [vmem:[%s5994_s0 + $0x554] ss:$20 sps:$4 sm:$0xff]  }
  0x27   :  { %1987 = vmatprep.subr.bf16.mxu0 %v4345_v0  ;;  %3941 = vmatprep.subr.bf16.mxu1 %v4345_v0 }
  0x2a   :  { %1988 = vmatpush2.bf16.msra.mxu0 %v3976_v13  ;;  %3957 = vmatpush2.bf16.msra.mxu1 %v3976_v13  ;;  %v4048_v13 = vld [vmem:[%s5994_s0 + $0x168] ss:$20 sps:$4 sm:$0xff]  }
  0x2b   :  { %1989 = vmatprep.subr.bf16.mxu0 %v4345_v0  ;;  %3942 = vmatprep.subr.bf16.mxu1 %v4345_v0 }
  0x2e   :  { %1990 = vmatpush2.bf16.msra.mxu0 %v3977_v14  ;;  %3958 = vmatpush2.bf16.msra.mxu1 %v3977_v14  ;;  %v4049_v14 = vld [vmem:[%s5994_s0 + $0x550] ss:$20 sps:$4 sm:$0xff]  }
  0x2f   :  { %1991 = vmatprep.subr.bf16.mxu0 %v4345_v0  ;;  %3943 = vmatprep.subr.bf16.mxu1 %v4345_v0 }
  0x32   :  { %1992 = vmatpush2.bf16.msra.mxu0 %v3978_v15  ;;  %3959 = vmatpush2.bf16.msra.mxu1 %v3978_v15  ;;  %v4050_v15 = vld [vmem:[%s5994_s0 + $0x194] ss:$20 sps:$4 sm:$0xff]  }
  0x33   :  { %1993 = vmatprep.subr.bf16.mxu0 %v4345_v0  ;;  %3944 = vmatprep.subr.bf16.mxu1 %v4345_v0 }
  0x36   :  { %1994 = vmatpush2.bf16.msra.mxu0 %v3979_v16  ;;  %3960 = vmatpush2.bf16.msra.mxu1 %v3979_v16  ;;  %v4055_v16 = vld [vmem:[%s5994_s0 + $0x190] ss:$20 sps:$4 sm:$0xff]  }
  0x37   :  { %1995 = vmatprep.subr.bf16.mxu0 %v4345_v0  ;;  %3945 = vmatprep.subr.bf16.mxu1 %v4345_v0 }
  0x3a   :  { %1996 = vmatpush2.bf16.msra.mxu0 %v3980_v17  ;;  %3961 = vmatpush2.bf16.msra.mxu1 %v3980_v17  ;;  %v4056_v17 = vld [vmem:[%s5994_s0 + $0x578] ss:$20 sps:$4 sm:$0xff]  }
  0x3b   :  { %1997 = vmatprep.subr.bf16.mxu0 %v4345_v0  ;;  %3946 = vmatprep.subr.bf16.mxu1 %v4345_v0 }
  0x3e   :  { %1998 = vmatpush2.bf16.msra.mxu0 %v3981_v18  ;;  %3962 = vmatpush2.bf16.msra.mxu1 %v3981_v18  ;;  %v4057_v18 = vld [vmem:[%s5994_s0 + $0x1bc] ss:$20 sps:$4 sm:$0xff]  }
  0x3f   :  { %3727 = vmatprep.subr.bf16.mxu0 %v5996_v24  ;;  %2392 = vmatprep.subr.bf16.mxu1 %v4345_v0 }
  0x41   :  { %2000 = vmatmul.mubr.bf16.vlgmr.msra.gmra.mxu0 %v3982_v19  ;;  %2200 = vmatmul.mubr.bf16.vlgmr.msra.gmra.mxu1 %v3985_v20  ;;  %v4059_v19 = vld [vmem:[%s5994_s0 + $0x5a4] ss:$20 sps:$4 sm:$0xff]  }
  0x42   :  { %3728 = vmatpush3.bf16.msra.mxu0 %v3988_v21  ;;  %2007 = vmatprep.mubr.bf16.mxu0 %v3989_v22  ;;  %v4061_v20 = vld [vmem:[%s5994_s0 + $0x1b8] ss:$20 sps:$4 sm:$0xff]   ;;  %v4062_v21 = vld [vmem:[%s5994_s0 + $0x5a0] ss:$20 sps:$4 sm:$0xff]  }
  0x43   :  { %2207 = vmatprep.mubr.bf16.mxu1 %v3991_v23  ;;  %2393 = vmatpush1.bf16.msra.mxu1 %v3993_v25  ;;  %v4064_v22 = vld [vmem:[%s5994_s0 + $0x1e4] ss:$20 sps:$4 sm:$0xff]   ;;  %v4066_v23 = vld [vmem:[%s5994_s0 + $0x5cc] ss:$20 sps:$4 sm:$0xff]  }
  0x44   :  { %2394 = vmatprep.subr.bf16.mxu1 %v4345_v0  ;;  %3729 = vmatprep.subr.bf16.mxu0 %v5996_v24  ;;  %v4068_v25 = vld [vmem:[%s5994_s0 + $0x1e0] ss:$20 sps:$4 sm:$0xff]  }
  0x46   :  { %3730 = vmatpush3.bf16.msra.mxu0 %v4029_v26  ;;  %v4069_v26 = vld [vmem:[%s5994_s0 + $0x5c8] ss:$20 sps:$4 sm:$0xff]  }
  0x47   :  { %2395 = vmatpush1.bf16.msra.mxu1 %v4002_v28  ;;  %3731 = vmatprep.subr.bf16.mxu0 %v5996_v24  ;;  %v4073_v28 = vld [vmem:[%s5994_s0 + $0x5f4] ss:$20 sps:$4 sm:$0xff]  }
  0x48   :  { %2396 = vmatprep.subr.bf16.mxu1 %v4345_v0 }
  0x49   :  { %2008 = vmatmul.mubr.bf16.gmra.mxu0 %v3994_v27  ;;  %2208 = vmatmul.mubr.bf16.gmra.mxu1 %v3995_v29  ;;  %v4071_v27 = vld [vmem:[%s5994_s0 + $0x20c] ss:$20 sps:$4 sm:$0xff]   ;;  %v4076_v29 = vld [vmem:[%s5994_s0 + $0x208] ss:$20 sps:$4 sm:$0xff]  }
  0x4a   :  { %2015 = vmatprep.mubr.bf16.mxu0 %v3996_v30  ;;  %2215 = vmatprep.mubr.bf16.mxu1 %v3998_v31  ;;  %v4077_v30 = vld [vmem:[%s5994_s0 + $0x5f0] ss:$20 sps:$4 sm:$0xff]   ;;  %v4078_v31 = vld [vmem:[%s5994_s0 + $0x234] ss:$20 sps:$4 sm:$0xff]  }
  0x4b   :  { %2397 = vmatpush1.bf16.msra.mxu1 %v4013_v32  ;;  %3732 = vmatpush3.bf16.msra.mxu0 %v4070_v33  ;;  %v4080_v32 = vld [vmem:[%s5994_s0 + $0x61c] ss:$20 sps:$4 sm:$0xff]  }
  0x4c   :  { %2398 = vmatprep.subr.bf16.mxu1 %v4345_v0  ;;  %3733 = vmatprep.subr.bf16.mxu0 %v5996_v24  ;;  %v4082_v33 = vld [vmem:[%s5994_s0 + $0x230] ss:$20 sps:$4 sm:$0xff]  }
  0x4f   :  { %2399 = vmatpush1.bf16.msra.mxu1 %v4022_v34  ;;  %3734 = vmatpush3.bf16.msra.mxu0 %v4116_v45  ;;  %v4083_v34 = vld [vmem:[%s5994_s0 + $0x618] ss:$20 sps:$4 sm:$0xff]   ;;  %v4102_v45 = vld [vmem:[%s5994_s0 + $0x2a8] ss:$20 sps:$4 sm:$0xff]  }
  0x50   :  { %2400 = vmatprep.subr.bf16.mxu1 %v4345_v0 }
  0x51   :  { %2016 = vmatmul.mubr.bf16.gmra.mxu0 %v4000_v35  ;;  %2216 = vmatmul.mubr.bf16.gmra.mxu1 %v4001_v36  ;;  %v4085_v35 = vld [vmem:[%s5994_s0 + $0x25c] ss:$20 sps:$4 sm:$0xff]   ;;  %v4087_v36 = vld [vmem:[%s5994_s0 + $0x644] ss:$20 sps:$4 sm:$0xff]  }
  0x52   :  { %2023 = vmatprep.mubr.bf16.mxu0 %v4003_v37  ;;  %2223 = vmatprep.mubr.bf16.mxu1 %v4005_v38  ;;  %v4089_v37 = vld [vmem:[%s5994_s0 + $0x258] ss:$20 sps:$4 sm:$0xff]   ;;  %v4090_v38 = vld [vmem:[%s5994_s0 + $0x640] ss:$20 sps:$4 sm:$0xff]  }
  0x53   :  { %2401 = vmatpush1.bf16.msra.mxu1 %v4034_v39  ;;  %v4091_v39 = vld [vmem:[%s5994_s0 + $0x284] ss:$20 sps:$4 sm:$0xff]  }
  0x54   :  { %2402 = vmatprep.subr.bf16.mxu1 %v4345_v0 }
  0x57   :  { %2403 = vmatpush1.bf16.msra.mxu1 %v4043_v42  ;;  %v4097_v42 = vld [vmem:[%s5994_s0 + $0x668] ss:$20 sps:$4 sm:$0xff]  }
  0x58   :  { %2404 = vmatprep.subr.bf16.mxu1 %v4345_v0 }
  0x59   :  { %2024 = vmatmul.mubr.bf16.gmra.mxu0 %v4007_v40  ;;  %2224 = vmatmul.mubr.bf16.gmra.mxu1 %v4008_v41  ;;  %v4093_v40 = vld [vmem:[%s5994_s0 + $0x66c] ss:$20 sps:$4 sm:$0xff]  }
  0x5a   :  { %2031 = vmatprep.mubr.bf16.mxu0 %v4009_v43  ;;  %2231 = vmatprep.mubr.bf16.mxu1 %v4011_v44  ;;  %v4096_v41 = vld [vmem:[%s5994_s0 + $0x280] ss:$20 sps:$4 sm:$0xff]  }
  0x5b   :  { %2405 = vmatpush1.bf16.msra.mxu1 %v4054_v46  ;;  %v4098_v43 = vld [vmem:[%s5994_s0 + $0x2ac] ss:$20 sps:$4 sm:$0xff]   ;;  %v4100_v44 = vld [vmem:[%s5994_s0 + $0x694] ss:$20 sps:$4 sm:$0xff]   ;;  %v4103_v46 = vld [vmem:[%s5994_s0 + $0x690] ss:$20 sps:$4 sm:$0xff]  }
  0x5c   :  { %2406 = vmatprep.subr.bf16.mxu1 %v4345_v0 }
  0x5f   :  { %2407 = vmatpush1.bf16.msra.mxu1 %v4063_v47  ;;  %v4105_v47 = vld [vmem:[%s5994_s0 + $0x2d4] ss:$20 sps:$4 sm:$0xff]  }
  0x60   :  { %2408 = vmatprep.subr.bf16.mxu1 %v4345_v0 }
  0x61   :  { %2032 = vmatmul.mubr.bf16.gmra.mxu0 %v4014_v48  ;;  %2232 = vmatmul.mubr.bf16.gmra.mxu1 %v4015_v49  ;;  %v4107_v48 = vld [vmem:[%s5994_s0 + $0x6bc] ss:$20 sps:$4 sm:$0xff]  }
  0x62   :  { %2039 = vmatprep.mubr.bf16.mxu0 %v4016_v50  ;;  %2239 = vmatprep.mubr.bf16.mxu1 %v4018_v51  ;;  %v4109_v49 = vld [vmem:[%s5994_s0 + $0x2d0] ss:$20 sps:$4 sm:$0xff]   ;;  %v4110_v50 = vld [vmem:[%s5994_s0 + $0x6b8] ss:$20 sps:$4 sm:$0xff]  }
  0x63   :  { %2409 = vmatpush2.bf16.msra.mxu1 %v4075_v52  ;;  %v4111_v51 = vld [vmem:[%s5994_s0 + $0x2fc] ss:$20 sps:$4 sm:$0xff]   ;;  %v4113_v52 = vld [vmem:[%s5994_s0 + $0x6e4] ss:$20 sps:$4 sm:$0xff]  }
  0x64   :  { %2410 = vmatprep.subr.bf16.mxu1 %v4345_v0 }
  0x67   :  { %2411 = vmatpush2.bf16.msra.mxu1 %v4084_v53  ;;  %v4117_v53 = vld [vmem:[%s5994_s0 + $0x2f8] ss:$20 sps:$4 sm:$0xff]  }
  0x68   :  { %2412 = vmatprep.subr.bf16.mxu1 %v4345_v0 }
  0x69   :  { %2040 = vmatmul.mubr.bf16.gmra.mxu0 %v4020_v54  ;;  %2240 = vmatmul.mubr.bf16.gmra.mxu1 %v4021_v55  ;;  %v4118_v54 = vld [vmem:[%s5994_s0 + $0x6e0] ss:$20 sps:$4 sm:$0xff]   ;;  %v4119_v55 = vld [vmem:[%s5994_s0 + $0x324] ss:$20 sps:$4 sm:$0xff]  }
  0x6a   :  { %2047 = vmatprep.mubr.bf16.mxu0 %v4023_v56  ;;  %2247 = vmatprep.mubr.bf16.mxu1 %v4025_v57  ;;  %v4121_v56 = vld [vmem:[%s5994_s0 + $0x70c] ss:$20 sps:$4 sm:$0xff]  }
  0x6b   :  { %2413 = vmatpush2.bf16.msra.mxu1 %v4095_v58  ;;  %v4123_v57 = vld [vmem:[%s5994_s0 + $0x320] ss:$20 sps:$4 sm:$0xff]   ;;  %v4124_v58 = vld [vmem:[%s5994_s0 + $0x708] ss:$20 sps:$4 sm:$0xff]  }
  0x6c   :  { %2414 = vmatprep.subr.bf16.mxu1 %v4345_v0 }
  0x6f   :  { %2415 = vmatpush2.bf16.msra.mxu1 %v4104_v59  ;;  %v4126_v59 = vld [vmem:[%s5994_s0 + $0x34c] ss:$20 sps:$4 sm:$0xff]  }
  0x70   :  { %2416 = vmatprep.subr.bf16.mxu1 %v4345_v0 }
  0x71   :  { %2048 = vmatmul.mubr.bf16.gmra.mxu0 %v4027_v60  ;;  %2248 = vmatmul.mubr.bf16.gmra.mxu1 %v4028_v61  ;;  %v4128_v60 = vld [vmem:[%s5994_s0 + $0x734] ss:$20 sps:$4 sm:$0xff]  }
  0x72   :  { %2055 = vmatprep.mubr.bf16.mxu0 %v4030_v62  ;;  %2255 = vmatprep.mubr.bf16.mxu1 %v4032_v63  ;;  %v4130_v61 = vld [vmem:[%s5994_s0 + $0x348] ss:$20 sps:$4 sm:$0xff]   ;;  %v4131_v62 = vld [vmem:[%s5994_s0 + $0x730] ss:$20 sps:$4 sm:$0xff]  }
  0x73   :  { %2417 = vmatpush2.bf16.msra.mxu1 %v4115_v1  ;;  %v4132_v63 = vld [vmem:[%s5994_s0 + $0x374] ss:$20 sps:$4 sm:$0xff]   ;;  %v4134_v1 = vld [vmem:[%s5994_s0 + $0x75c] ss:$20 sps:$4 sm:$0xff]  }
  0x74   :  { %2418 = vmatprep.subr.bf16.mxu1 %v4345_v0 }
  0x77   :  { %2419 = vmatpush2.bf16.msra.mxu1 %v4125_v2  ;;  %v4137_v2 = vld [vmem:[%s5994_s0 + $0x370] ss:$20 sps:$4 sm:$0xff]  }
  0x78   :  { %2420 = vmatprep.subr.bf16.mxu1 %v4345_v0 }
  0x79   :  { %2056 = vmatmul.mubr.bf16.gmra.mxu0 %v4035_v3  ;;  %2256 = vmatmul.mubr.bf16.gmra.mxu1 %v4036_v4  ;;  %v4138_v3 = vld [vmem:[%s5994_s0 + $0x758] ss:$20 sps:$4 sm:$0xff]   ;;  %v4139_v4 = vld [vmem:[%s5994_s0 + $0x39c] ss:$20 sps:$4 sm:$0xff]  }
  0x7a   :  { %2063 = vmatprep.mubr.bf16.mxu0 %v4037_v5  ;;  %2263 = vmatprep.mubr.bf16.mxu1 %v4039_v6  ;;  %v4141_v5 = vld [vmem:[%s5994_s0 + $0x784] ss:$20 sps:$4 sm:$0xff]  }
  0x7b   :  { %2421 = vmatpush2.bf16.msra.mxu1 %v4136_v7  ;;  %v4143_v6 = vld [vmem:[%s5994_s0 + $0x398] ss:$20 sps:$4 sm:$0xff]   ;;  %v4144_v7 = vld [vmem:[%s5994_s0 + $0x780] ss:$20 sps:$4 sm:$0xff]  }
  0x7c   :  { %2422 = vmatprep.subr.bf16.mxu1 %v4345_v0  ;;  %v4052_v0 = vld [vmem:[%s5994_s0 + $0x57c] ss:$20 sps:$4 sm:$0xff]  }
  0x7f   :  { %2423 = vmatpush2.bf16.msra.mxu1 %v4145_v8  ;;  %v4146_v8 = vld [vmem:[%s5994_s0 + $0x3c4] ss:$20 sps:$4 sm:$0xff]  }
  0x81   :  { %2064 = vmatmul.mubr.bf16.gmra.mxu0 %v4041_v9  ;;  %2264 = vmatmul.mubr.bf16.gmra.mxu1 %v4042_v10  ;;  %v4150_v9 = vld [vmem:[%s5994_s0 + $0xc] ss:$20 sps:$4 sm:$0xff]   ;;  %v4148_v10 = vld [vmem:[%s5994_s0 + $0x8] ss:$20 sps:$4 sm:$0xff]  }
  0x82   :  { %2071 = vmatprep.mubr.bf16.mxu0 %v4044_v11  ;;  %2271 = vmatprep.mubr.bf16.mxu1 %v4046_v12  ;;  %v4151_v11 = vld [vmem:[%s5994_s0 + $0x3c0] ss:$20 sps:$4 sm:$0xff]  }
  0x83   :  { %v4152_v12 = vld [vmem:[%s5994_s0 + $0x34] ss:$20 sps:$4 sm:$0xff]  }
  0x89   :  { %2072 = vmatmul.mubr.bf16.gmra.mxu0 %v4048_v13  ;;  %2272 = vmatmul.mubr.bf16.gmra.mxu1 %v4049_v14 }
  0x8a   :  { %2079 = vmatprep.mubr.bf16.mxu0 %v4050_v15  ;;  %2279 = vmatprep.mubr.bf16.mxu1 %v4052_v0 }
  0x91   :  { %2080 = vmatmul.mubr.bf16.gmra.mxu0 %v4055_v16  ;;  %2280 = vmatmul.mubr.bf16.gmra.mxu1 %v4056_v17 }
  0x92   :  { %2087 = vmatprep.mubr.bf16.mxu0 %v4057_v18  ;;  %2287 = vmatprep.mubr.bf16.mxu1 %v4059_v19  ;;  %v4154_v18 = vld [vmem:[%s5994_s0 + $0x30] ss:$20 sps:$4 sm:$0xff]  }
  0x93   :  { %v4155_v19 = vld [vmem:[%s5994_s0 + $0x10] ss:$20 sps:$4 sm:$0xff]  }
  0x99   :  { %2088 = vmatmul.mubr.bf16.gmra.mxu0 %v4061_v20  ;;  %2288 = vmatmul.mubr.bf16.gmra.mxu1 %v4062_v21  ;;  %v4156_v20 = vld [vmem:[%s5994_s0 + $0x5c] ss:$20 sps:$4 sm:$0xff]  }
  0x9a   :  { %2095 = vmatprep.mubr.bf16.mxu0 %v4064_v22  ;;  %2295 = vmatprep.mubr.bf16.mxu1 %v4066_v23 }
  0xa1   :  { %2096 = vmatmul.mubr.bf16.gmra.mxu0 %v4068_v25  ;;  %2296 = vmatmul.mubr.bf16.gmra.mxu1 %v4069_v26 }
  0xa2   :  { %2103 = vmatprep.mubr.bf16.mxu0 %v4071_v27  ;;  %2303 = vmatprep.mubr.bf16.mxu1 %v4073_v28 }
  0xa9   :  { %2104 = vmatmul.mubr.bf16.gmra.mxu0 %v4076_v29  ;;  %2304 = vmatmul.mubr.bf16.gmra.mxu1 %v4077_v30  ;;  %v4158_v30 = vld [vmem:[%s5994_s0 + $0x58] ss:$20 sps:$4 sm:$0xff]  }
  0xaa   :  { %2111 = vmatprep.mubr.bf16.mxu0 %v4078_v31  ;;  %2311 = vmatprep.mubr.bf16.mxu1 %v4080_v32  ;;  %v4159_v31 = vld [vmem:[%s5994_s0 + $0x38] ss:$20 sps:$4 sm:$0xff]  }
  0xab   :  { %v4160_v32 = vld [vmem:[%s5994_s0 + $0x84] ss:$20 sps:$4 sm:$0xff]  }
  0xb1   :  { %2112 = vmatmul.mubr.bf16.gmra.mxu0 %v4082_v33  ;;  %2312 = vmatmul.mubr.bf16.gmra.mxu1 %v4083_v34 }
  0xb2   :  { %2119 = vmatprep.mubr.bf16.mxu0 %v4085_v35  ;;  %2319 = vmatprep.mubr.bf16.mxu1 %v4087_v36 }
  0xb9   :  { %2120 = vmatmul.mubr.bf16.gmra.mxu0 %v4089_v37  ;;  %2320 = vmatmul.mubr.bf16.gmra.mxu1 %v4090_v38 }
  0xba   :  { %2127 = vmatprep.mubr.bf16.mxu0 %v4091_v39  ;;  %2327 = vmatprep.mubr.bf16.mxu1 %v4093_v40 }
  0xc1   :  { %2128 = vmatmul.mubr.bf16.gmra.mxu0 %v4096_v41  ;;  %2328 = vmatmul.mubr.bf16.gmra.mxu1 %v4097_v42  ;;  %v4162_v41 = vld [vmem:[%s5994_s0 + $0x80] ss:$20 sps:$4 sm:$0xff]  }
  0xc2   :  { %2135 = vmatprep.mubr.bf16.mxu0 %v4098_v43  ;;  %2335 = vmatprep.mubr.bf16.mxu1 %v4100_v44  ;;  %v4163_v42 = vld [vmem:[%s5994_s0 + $0x60] ss:$20 sps:$4 sm:$0xff]  }
  0xc3   :  { %v4166_v43 = vld [vmem:[%s5994_s0 + $0xac] ss:$20 sps:$4 sm:$0xff]  }
  0xc9   :  { %2136 = vmatmul.mubr.bf16.gmra.mxu0 %v4102_v45  ;;  %2336 = vmatmul.mubr.bf16.gmra.mxu1 %v4103_v46 }
  0xca   :  { %2143 = vmatprep.mubr.bf16.mxu0 %v4105_v47  ;;  %2343 = vmatprep.mubr.bf16.mxu1 %v4107_v48 }
  0xd1   :  { %2144 = vmatmul.mubr.bf16.gmra.mxu0 %v4109_v49  ;;  %2344 = vmatmul.mubr.bf16.gmra.mxu1 %v4110_v50 }
  0xd2   :  { %2151 = vmatprep.mubr.bf16.mxu0 %v4111_v51  ;;  %2351 = vmatprep.mubr.bf16.mxu1 %v4113_v52  ;;  %v4164_v52 = vld [vmem:[%s5994_s0 + $0xa8] ss:$20 sps:$4 sm:$0xff]  }
  0xd9   :  { %2152 = vmatmul.mubr.bf16.gmra.mxu0 %v4117_v53  ;;  %2352 = vmatmul.mubr.bf16.gmra.mxu1 %v4118_v54  ;;  %v4167_v53 = vld [vmem:[%s5994_s0 + $0x88] ss:$20 sps:$4 sm:$0xff]  }
  0xda   :  { %2159 = vmatprep.mubr.bf16.mxu0 %v4119_v55  ;;  %2359 = vmatprep.mubr.bf16.mxu1 %v4121_v56  ;;  %v4170_v54 = vld [vmem:[%s5994_s0 + $0xd4] ss:$20 sps:$4 sm:$0xff]  }
  0xe1   :  { %2160 = vmatmul.mubr.bf16.gmra.mxu0 %v4123_v57  ;;  %2360 = vmatmul.mubr.bf16.gmra.mxu1 %v4124_v58 }
  0xe2   :  { %2167 = vmatprep.mubr.bf16.mxu0 %v4126_v59  ;;  %2367 = vmatprep.mubr.bf16.mxu1 %v4128_v60 }
  0xe9   :  { %2168 = vmatmul.mubr.bf16.gmra.mxu0 %v4130_v61  ;;  %2368 = vmatmul.mubr.bf16.gmra.mxu1 %v4131_v62 }
  0xea   :  { %2175 = vmatprep.mubr.bf16.mxu0 %v4132_v63  ;;  %2375 = vmatprep.mubr.bf16.mxu1 %v4134_v1  ;;  %v4168_v63 = vld [vmem:[%s5994_s0 + $0xd0] ss:$20 sps:$4 sm:$0xff]  }
  0xeb   :  { %v4171_v1 = vld [vmem:[%s5994_s0 + $0xb0] ss:$20 sps:$4 sm:$0xff]  }
  0xf1   :  { %2176 = vmatmul.mubr.bf16.gmra.mxu0 %v4137_v2  ;;  %2376 = vmatmul.mubr.bf16.gmra.mxu1 %v4138_v3  ;;  %v4174_v2 = vld [vmem:[%s5994_s0 + $0xfc] ss:$20 sps:$4 sm:$0xff]  }
  0xf2   :  { %2183 = vmatprep.mubr.bf16.mxu0 %v4139_v4  ;;  %2383 = vmatprep.mubr.bf16.mxu1 %v4141_v5 }
  0xf9   :  { %2184 = vmatmul.mubr.bf16.gmra.mxu0 %v4143_v6  ;;  %2384 = vmatmul.mubr.bf16.gmra.mxu1 %v4144_v7 }
  0xfa   :  { %2191 = vmatprep.mubr.bf16.mxu0 %v4146_v8  ;;  %2424 = vmatprep.mubr.bf16.mxu1 %v4150_v9 }
 0x101   :  { %v4826_v13 = vpop.f32.mrf.mxu0  ;;  %2192 = vmatmul.mubr.bf16.gmra.mxu0 %v4151_v11  ;;  %v4828_v14 = vpop.f32.mrf.mxu1  ;;  %2425 = vmatmul.mubr.bf16.vlgmr.msra.gmra.mxu1 %v4148_v10  ;;  %v4172_v11 = vld [vmem:[%s5994_s0 + $0xf8] ss:$20 sps:$4 sm:$0xff]  }
 0x102   :  { %5998 = vst [vmem:[#allocation2_spill] sm:$0xff] %v4828_v14  ;;  %2432 = vmatprep.mubr.bf16.mxu1 %v4152_v12  ;;  %3735 = vmatprep.mubr.msk.bf16.mxu0 %vm4347_vm0, %v5996_v24  ;;  %v4175_v12 = vld [vmem:[%s5994_s0 + $0xd8] ss:$20 sps:$4 sm:$0xff]  }
 0x103   :  { %v2003_v15 = vpop.f32.mrf.mxu0  ;;  %v2203_v0 = vpop.f32.mrf.mxu1 }
 0x104   :  { %v4178_v15 = vld [vmem:[%s5994_s0 + $0x124] ss:$20 sps:$4 sm:$0xff]  }
 0x105   :  { %v4832_v16 = vpop.f32.mrf.mxu0  ;;  %v4834_v17 = vpop.f32.mrf.mxu1 }
 0x106   :  { %5999 = vst [vmem:[#allocation3_spill] sm:$0xff] %v4834_v17 }
 0x107   :  { %v2006_v21 = vpop.f32.mrf.mxu0  ;;  %v2206_v22 = vpop.f32.mrf.mxu1 }
 0x109   :  { %v4845_v23 = vpop.f32.mrf.mxu0  ;;  %v4847_v25 = vpop.f32.mrf.mxu1  ;;  %2433 = vmatmul.mubr.bf16.gmra.mxu1 %v4154_v18  ;;  %3736 = vmatmul.mubr.msk.bf16.vlgmr.msra.gmra.mxu0 %vm1819_vm1, %v4155_v19 }
 0x10a   :  { %6000 = vst [vmem:[#allocation4_spill] sm:$0xff] %v4847_v25  ;;  %2440 = vmatprep.mubr.bf16.mxu1 %v4156_v20  ;;  %3739 = vmatprep.mubr.msk.bf16.mxu0 %vm4347_vm0, %v5996_v24  ;;  %v6047_v25 = vmov 0.0  }
 0x10b   :  { %v2011_v26 = vpop.f32.mrf.mxu0  ;;  %v2211_v27 = vpop.f32.mrf.mxu1 }
 0x10d   :  { %v4852_v28 = vpop.f32.mrf.mxu0  ;;  %v4854_v29 = vpop.f32.mrf.mxu1 }
 0x10e   :  { %6001 = vst [vmem:[#allocation5_spill] sm:$0xff] %v4854_v29 }
 0x10f   :  { %v2014_v33 = vpop.f32.mrf.mxu0  ;;  %v2214_v34 = vpop.f32.mrf.mxu1 }
 0x111   :  { %v4865_v35 = vpop.f32.mrf.mxu0  ;;  %v4867_v36 = vpop.f32.mrf.mxu1  ;;  %2441 = vmatmul.mubr.bf16.gmra.mxu1 %v4158_v30  ;;  %3740 = vmatmul.mubr.msk.bf16.gmra.mxu0 %vm1819_vm1, %v4159_v31  ;;  %v4176_v30 = vld [vmem:[%s5994_s0 + $0x120] ss:$20 sps:$4 sm:$0xff]  }
 0x112   :  { %6002 = vst [vmem:[#allocation6_spill] sm:$0xff] %v4867_v36  ;;  %2448 = vmatprep.mubr.bf16.mxu1 %v4160_v32  ;;  %3743 = vmatprep.mubr.msk.bf16.mxu0 %vm4347_vm0, %v5996_v24  ;;  %v4179_v31 = vld [vmem:[%s5994_s0 + $0x100] ss:$20 sps:$4 sm:$0xff]  }
 0x113   :  { %v2019_v37 = vpop.f32.mrf.mxu0  ;;  %v2219_v38 = vpop.f32.mrf.mxu1  ;;  %v4182_v32 = vld [vmem:[%s5994_s0 + $0x14c] ss:$20 sps:$4 sm:$0xff]  }
 0x115   :  { %v4872_v39 = vpop.f32.mrf.mxu0  ;;  %v4874_v40 = vpop.f32.mrf.mxu1 }
 0x116   :  { %6003 = vst [vmem:[#allocation7_spill] sm:$0xff] %v4874_v40 }
 0x117   :  { %v2022_v44 = vpop.f32.mrf.mxu0  ;;  %v2222_v45 = vpop.f32.mrf.mxu1 }
 0x118   :  { %v4180_v45 = vld [vmem:[%s5994_s0 + $0x148] ss:$20 sps:$4 sm:$0xff]  }
 0x119   :  { %v4885_v46 = vpop.f32.mrf.mxu0  ;;  %v4887_v47 = vpop.f32.mrf.mxu1  ;;  %2449 = vmatmul.mubr.bf16.gmra.mxu1 %v4162_v41  ;;  %3744 = vmatmul.mubr.msk.bf16.gmra.mxu0 %vm1819_vm1, %v4163_v42 }
 0x11a   :  { %6004 = vst [vmem:[#allocation8_spill] sm:$0xff] %v4887_v47  ;;  %2456 = vmatprep.mubr.bf16.mxu1 %v4166_v43  ;;  %3747 = vmatprep.mubr.msk.bf16.mxu0 %vm4347_vm0, %v5996_v24 }
 0x11b   :  { %v2027_v48 = vpop.f32.mrf.mxu0  ;;  %v2227_v49 = vpop.f32.mrf.mxu1 }
 0x11c   :  { %v4183_v48 = vld [vmem:[%s5994_s0 + $0x128] ss:$20 sps:$4 sm:$0xff]  }
 0x11d   :  { %v4892_v50 = vpop.f32.mrf.mxu0  ;;  %v4894_v51 = vpop.f32.mrf.mxu1  ;;  %v4186_v49 = vld [vmem:[%s5994_s0 + $0x174] ss:$20 sps:$4 sm:$0xff]  }
 0x11e   :  { %6005 = vst [vmem:[#allocation9_spill] sm:$0xff] %v4894_v51 }
 0x11f   :  { %v2030_v55 = vpop.f32.mrf.mxu0  ;;  %v2230_v56 = vpop.f32.mrf.mxu1 }
 0x121   :  { %v4905_v57 = vpop.f32.mrf.mxu0  ;;  %v4907_v58 = vpop.f32.mrf.mxu1  ;;  %2457 = vmatmul.mubr.bf16.gmra.mxu1 %v4164_v52  ;;  %3748 = vmatmul.mubr.msk.bf16.gmra.mxu0 %vm1819_vm1, %v4167_v53 }
 0x122   :  { %6006 = vst [vmem:[#allocation10_spill] sm:$0xff] %v4907_v58  ;;  %2464 = vmatprep.mubr.bf16.mxu1 %v4170_v54  ;;  %3751 = vmatprep.mubr.msk.bf16.mxu0 %vm4347_vm0, %v5996_v24 }
 0x123   :  { %v2035_v59 = vpop.f32.mrf.mxu0  ;;  %v2235_v60 = vpop.f32.mrf.mxu1 }
 0x125   :  { %v4912_v61 = vpop.f32.mrf.mxu0  ;;  %v4914_v62 = vpop.f32.mrf.mxu1 }
 0x126   :  { %6007 = vst [vmem:[#allocation11_spill] sm:$0xff] %v4914_v62 }
 0x127   :  { %v2038_v3 = vpop.f32.mrf.mxu0  ;;  %v2238_v4 = vpop.f32.mrf.mxu1 }
 0x128   :  { %v4190_v3 = vld [vmem:[%s5994_s0 + $0x19c] ss:$20 sps:$4 sm:$0xff]  }
 0x129   :  { %v4925_v5 = vpop.f32.mrf.mxu0  ;;  %v4927_v6 = vpop.f32.mrf.mxu1  ;;  %2465 = vmatmul.mubr.bf16.gmra.mxu1 %v4168_v63  ;;  %3752 = vmatmul.mubr.msk.bf16.gmra.mxu0 %vm1819_vm1, %v4171_v1  ;;  %v4184_v1 = vld [vmem:[%s5994_s0 + $0x170] ss:$20 sps:$4 sm:$0xff]  }
 0x12a   :  { %6008 = vst [vmem:[#allocation12_spill] sm:$0xff] %v4927_v6  ;;  %2472 = vmatprep.mubr.bf16.mxu1 %v4174_v2  ;;  %3755 = vmatprep.mubr.msk.bf16.mxu0 %vm4347_vm0, %v5996_v24  ;;  %v4187_v2 = vld [vmem:[%s5994_s0 + $0x150] ss:$20 sps:$4 sm:$0xff]  }
 0x12b   :  { %v2043_v7 = vpop.f32.mrf.mxu0  ;;  %v2243_v8 = vpop.f32.mrf.mxu1 }
 0x12d   :  { %v4932_v9 = vpop.f32.mrf.mxu0  ;;  %v4934_v10 = vpop.f32.mrf.mxu1 }
 0x12e   :  { %6009 = vst [vmem:[#allocation13_spill] sm:$0xff] %v4934_v10 }
 0x12f   :  { %v2046_v0 = vpop.f32.mrf.mxu0  ;;  %v2246_v18 = vpop.f32.mrf.mxu1 }
 0x131   :  { %v4945_v19 = vpop.f32.mrf.mxu0  ;;  %v4947_v20 = vpop.f32.mrf.mxu1  ;;  %2473 = vmatmul.mubr.bf16.gmra.mxu1 %v4172_v11  ;;  %3756 = vmatmul.mubr.msk.bf16.gmra.mxu0 %vm1819_vm1, %v4175_v12 }
 0x132   :  { %6010 = vst [vmem:[#allocation14_spill] sm:$0xff] %v4947_v20  ;;  %2480 = vmatprep.mubr.bf16.mxu1 %v4178_v15  ;;  %3759 = vmatprep.mubr.msk.bf16.mxu0 %vm4347_vm0, %v5996_v24 }
 0x133   :  { %v2051_v21 = vpop.f32.mrf.mxu0  ;;  %v2251_v22 = vpop.f32.mrf.mxu1 }
 0x134   :  { %v4188_v21 = vld [vmem:[%s5994_s0 + $0x198] ss:$20 sps:$4 sm:$0xff]  }
 0x135   :  { %v4952_v26 = vpop.f32.mrf.mxu0  ;;  %v4954_v27 = vpop.f32.mrf.mxu1  ;;  %v4191_v22 = vld [vmem:[%s5994_s0 + $0x178] ss:$20 sps:$4 sm:$0xff]  }
 0x136   :  { %6011 = vst [vmem:[#allocation15_spill] sm:$0xff] %v4954_v27 }
 0x137   :  { %v2054_v33 = vpop.f32.mrf.mxu0  ;;  %v2254_v34 = vpop.f32.mrf.mxu1 }
 0x139   :  { %v4965_v37 = vpop.f32.mrf.mxu0  ;;  %v4967_v38 = vpop.f32.mrf.mxu1  ;;  %2481 = vmatmul.mubr.bf16.gmra.mxu1 %v4176_v30  ;;  %3760 = vmatmul.mubr.msk.bf16.gmra.mxu0 %vm1819_vm1, %v4179_v31  ;;  %v4194_v30 = vld [vmem:[%s5994_s0 + $0x1c4] ss:$20 sps:$4 sm:$0xff]  }
 0x13a   :  { %6012 = vst [vmem:[#allocation16_spill] sm:$0xff] %v4967_v38  ;;  %2488 = vmatprep.mubr.bf16.mxu1 %v4182_v32  ;;  %3763 = vmatprep.mubr.msk.bf16.mxu0 %vm4347_vm0, %v5996_v24 }
 0x13b   :  { %v2059_v41 = vpop.f32.mrf.mxu0  ;;  %v2259_v42 = vpop.f32.mrf.mxu1 }
 0x13d   :  { %v4972_v43 = vpop.f32.mrf.mxu0  ;;  %v4974_v44 = vpop.f32.mrf.mxu1 }
 0x13e   :  { %6013 = vst [vmem:[#allocation17_spill] sm:$0xff] %v4974_v44 }
 0x13f   :  { %v2062_v52 = vpop.f32.mrf.mxu0  ;;  %v2262_v53 = vpop.f32.mrf.mxu1 }
 0x140   :  { %v4195_v52 = vld [vmem:[%s5994_s0 + $0x1a0] ss:$20 sps:$4 sm:$0xff]  }
 0x141   :  { %v4985_v54 = vpop.f32.mrf.mxu0  ;;  %v4987_v55 = vpop.f32.mrf.mxu1  ;;  %2489 = vmatmul.mubr.bf16.gmra.mxu1 %v4180_v45  ;;  %3764 = vmatmul.mubr.msk.bf16.gmra.mxu0 %vm1819_vm1, %v4183_v48  ;;  %v4198_v53 = vld [vmem:[%s5994_s0 + $0x1ec] ss:$20 sps:$4 sm:$0xff]  }
 0x142   :  { %6014 = vst [vmem:[#allocation18_spill] sm:$0xff] %v4987_v55  ;;  %2496 = vmatprep.mubr.bf16.mxu1 %v4186_v49  ;;  %3767 = vmatprep.mubr.msk.bf16.mxu0 %vm4347_vm0, %v5996_v24  ;;  %v4192_v49 = vld [vmem:[%s5994_s0 + $0x1c0] ss:$20 sps:$4 sm:$0xff]  }
 0x143   :  { %v2067_v56 = vpop.f32.mrf.mxu0  ;;  %v2267_v59 = vpop.f32.mrf.mxu1 }
 0x145   :  { %v4992_v60 = vpop.f32.mrf.mxu0  ;;  %v4994_v63 = vpop.f32.mrf.mxu1 }
 0x146   :  { %6015 = vst [vmem:[#allocation19_spill] sm:$0xff] %v4994_v63 }
 0x147   :  { %v2070_v4 = vpop.f32.mrf.mxu0  ;;  %v2270_v7 = vpop.f32.mrf.mxu1 }
 0x149   :  { %v5005_v8 = vpop.f32.mrf.mxu0  ;;  %v5007_v11 = vpop.f32.mrf.mxu1  ;;  %2497 = vmatmul.mubr.bf16.gmra.mxu1 %v4184_v1  ;;  %3768 = vmatmul.mubr.msk.bf16.gmra.mxu0 %vm1819_vm1, %v4187_v2 }
 0x14a   :  { %6016 = vst [vmem:[#allocation20_spill] sm:$0xff] %v5007_v11  ;;  %2504 = vmatprep.mubr.bf16.mxu1 %v4190_v3  ;;  %3771 = vmatprep.mubr.msk.bf16.mxu0 %vm4347_vm0, %v5996_v24 }
 0x14b   :  { %v2075_v12 = vpop.f32.mrf.mxu0  ;;  %v2275_v15 = vpop.f32.mrf.mxu1 }
 0x14c   :  { %v4196_v15 = vld [vmem:[%s5994_s0 + $0x1e8] ss:$20 sps:$4 sm:$0xff]  }
 0x14d   :  { %v5012_v0 = vpop.f32.mrf.mxu0  ;;  %v5014_v18 = vpop.f32.mrf.mxu1 }
 0x14e   :  { %6017 = vst [vmem:[#allocation21_spill] sm:$0xff] %v5014_v18 }
 0x14f   :  { %v2078_v31 = vpop.f32.mrf.mxu0  ;;  %v2278_v32 = vpop.f32.mrf.mxu1 }
 0x151   :  { %v5025_v33 = vpop.f32.mrf.mxu0  ;;  %v5027_v34 = vpop.f32.mrf.mxu1  ;;  %2505 = vmatmul.mubr.bf16.gmra.mxu1 %v4188_v21  ;;  %3772 = vmatmul.mubr.msk.bf16.gmra.mxu0 %vm1819_vm1, %v4191_v22  ;;  %v4199_v21 = vld [vmem:[%s5994_s0 + $0x1c8] ss:$20 sps:$4 sm:$0xff]  }
 0x152   :  { %6018 = vst [vmem:[#allocation22_spill] sm:$0xff] %v5027_v34  ;;  %2512 = vmatprep.mubr.bf16.mxu1 %v4194_v30  ;;  %3775 = vmatprep.mubr.msk.bf16.mxu0 %vm4347_vm0, %v5996_v24  ;;  %v4202_v22 = vld [vmem:[%s5994_s0 + $0x214] ss:$20 sps:$4 sm:$0xff]  }
 0x153   :  { %v2083_v41 = vpop.f32.mrf.mxu0  ;;  %v2283_v42 = vpop.f32.mrf.mxu1 }
 0x155   :  { %v5032_v45 = vpop.f32.mrf.mxu0  ;;  %v5034_v48 = vpop.f32.mrf.mxu1 }
 0x156   :  { %6019 = vst [vmem:[#allocation23_spill] sm:$0xff] %v5034_v48 }
 0x157   :  { %v2086_v56 = vpop.f32.mrf.mxu0  ;;  %v2286_v59 = vpop.f32.mrf.mxu1 }
 0x158   :  { %v4200_v56 = vld [vmem:[%s5994_s0 + $0x210] ss:$20 sps:$4 sm:$0xff]  }
 0x159   :  { %v5045_v1 = vpop.f32.mrf.mxu0  ;;  %v5047_v2 = vpop.f32.mrf.mxu1  ;;  %2513 = vmatmul.mubr.bf16.gmra.mxu1 %v4192_v49  ;;  %3776 = vmatmul.mubr.msk.bf16.gmra.mxu0 %vm1819_vm1, %v4195_v52  ;;  %v4203_v59 = vld [vmem:[%s5994_s0 + $0x1f0] ss:$20 sps:$4 sm:$0xff]  }
 0x15a   :  { %6020 = vst [vmem:[#allocation24_spill] sm:$0xff] %v5047_v2  ;;  %2520 = vmatprep.mubr.bf16.mxu1 %v4198_v53  ;;  %3779 = vmatprep.mubr.msk.bf16.mxu0 %vm4347_vm0, %v5996_v24 }
 0x15b   :  { %v2091_v3 = vpop.f32.mrf.mxu0  ;;  %v2291_v4 = vpop.f32.mrf.mxu1 }
 0x15c   :  { %v4206_v3 = vld [vmem:[%s5994_s0 + $0x23c] ss:$20 sps:$4 sm:$0xff]  }
 0x15d   :  { %v5052_v7 = vpop.f32.mrf.mxu0  ;;  %v5054_v12 = vpop.f32.mrf.mxu1 }
 0x15e   :  { %6021 = vst [vmem:[#allocation25_spill] sm:$0xff] %v5054_v12 }
 0x15f   :  { %v2094_v30 = vpop.f32.mrf.mxu0  ;;  %v2294_v31 = vpop.f32.mrf.mxu1 }
 0x161   :  { %v5065_v32 = vpop.f32.mrf.mxu0  ;;  %v5067_v41 = vpop.f32.mrf.mxu1  ;;  %2521 = vmatmul.mubr.bf16.gmra.mxu1 %v4196_v15  ;;  %3780 = vmatmul.mubr.msk.bf16.gmra.mxu0 %vm1819_vm1, %v4199_v21 }
 0x162   :  { %6022 = vst [vmem:[#allocation26_spill] sm:$0xff] %v5067_v41  ;;  %2528 = vmatprep.mubr.bf16.mxu1 %v4202_v22  ;;  %3783 = vmatprep.mubr.msk.bf16.mxu0 %vm4347_vm0, %v5996_v24 }
 0x163   :  { %v2099_v42 = vpop.f32.mrf.mxu0  ;;  %v2299_v49 = vpop.f32.mrf.mxu1 }
 0x165   :  { %v5072_v52 = vpop.f32.mrf.mxu0  ;;  %v5074_v53 = vpop.f32.mrf.mxu1 }
 0x166   :  { %6023 = vst [vmem:[#allocation27_spill] sm:$0xff] %v5074_v53 }
 0x167   :  { %v2102_v4 = vpop.f32.mrf.mxu0  ;;  %v2302_v15 = vpop.f32.mrf.mxu1 }
 0x168   :  { %v4204_v4 = vld [vmem:[%s5994_s0 + $0x238] ss:$20 sps:$4 sm:$0xff]  }
 0x169   :  { %v5085_v21 = vpop.f32.mrf.mxu0  ;;  %v5087_v22 = vpop.f32.mrf.mxu1  ;;  %2529 = vmatmul.mubr.bf16.gmra.mxu1 %v4200_v56  ;;  %3784 = vmatmul.mubr.msk.bf16.gmra.mxu0 %vm1819_vm1, %v4203_v59  ;;  %v4207_v56 = vld [vmem:[%s5994_s0 + $0x218] ss:$20 sps:$4 sm:$0xff]  }
 0x16a   :  { %6024 = vst [vmem:[#allocation28_spill] sm:$0xff] %v5087_v22  ;;  %2536 = vmatprep.mubr.bf16.mxu1 %v4206_v3  ;;  %3787 = vmatprep.mubr.msk.bf16.mxu0 %vm4347_vm0, %v5996_v24  ;;  %v4210_v59 = vld [vmem:[%s5994_s0 + $0x264] ss:$20 sps:$4 sm:$0xff]  }
 0x16b   :  { %v2107_v30 = vpop.f32.mrf.mxu0  ;;  %v2307_v31 = vpop.f32.mrf.mxu1 }
 0x16d   :  { %v5092_v42 = vpop.f32.mrf.mxu0  ;;  %v5094_v49 = vpop.f32.mrf.mxu1 }
 0x16e   :  { %6025 = vst [vmem:[#allocation29_spill] sm:$0xff] %v5094_v49 }
 0x16f   :  { %v2110_v3 = vpop.f32.mrf.mxu0  ;;  %v2310_v15 = vpop.f32.mrf.mxu1 }
 0x170   :  { %v4208_v3 = vld [vmem:[%s5994_s0 + $0x260] ss:$20 sps:$4 sm:$0xff]  }
 0x171   :  { %v5105_v30 = vpop.f32.mrf.mxu0  ;;  %v5107_v31 = vpop.f32.mrf.mxu1  ;;  %2537 = vmatmul.mubr.bf16.gmra.mxu1 %v4204_v4  ;;  %3788 = vmatmul.mubr.msk.bf16.gmra.mxu0 %vm1819_vm1, %v4207_v56  ;;  %v4211_v4 = vld [vmem:[%s5994_s0 + $0x240] ss:$20 sps:$4 sm:$0xff]  }
 0x172   :  { %6026 = vst [vmem:[#allocation30_spill] sm:$0xff] %v5107_v31  ;;  %2544 = vmatprep.mubr.bf16.mxu1 %v4210_v59  ;;  %3791 = vmatprep.mubr.msk.bf16.mxu0 %vm4347_vm0, %v5996_v24  ;;  %v4214_v56 = vld [vmem:[%s5994_s0 + $0x28c] ss:$20 sps:$4 sm:$0xff]  }
 0x173   :  { %v2115_v49 = vpop.f32.mrf.mxu0  ;;  %v2315_v22 = vpop.f32.mrf.mxu1 }
 0x175   :  { %v5112_v53 = vpop.f32.mrf.mxu0  ;;  %v5114_v41 = vpop.f32.mrf.mxu1 }
 0x176   :  { %6027 = vst [vmem:[#allocation31_spill] sm:$0xff] %v5114_v41 }
 0x177   :  { %v2118_v59 = vpop.f32.mrf.mxu0  ;;  %v2318_v15 = vpop.f32.mrf.mxu1 }
 0x178   :  { %v4212_v59 = vld [vmem:[%s5994_s0 + $0x288] ss:$20 sps:$4 sm:$0xff]  }
 0x179   :  { %v5125_v49 = vpop.f32.mrf.mxu0  ;;  %v5127_v22 = vpop.f32.mrf.mxu1  ;;  %2545 = vmatmul.mubr.bf16.gmra.mxu1 %v4208_v3  ;;  %3792 = vmatmul.mubr.msk.bf16.gmra.mxu0 %vm1819_vm1, %v4211_v4  ;;  %v4215_v3 = vld [vmem:[%s5994_s0 + $0x268] ss:$20 sps:$4 sm:$0xff]  }
 0x17a   :  { %6028 = vst [vmem:[#allocation32_spill] sm:$0xff] %v5127_v22  ;;  %2552 = vmatprep.mubr.bf16.mxu1 %v4214_v56  ;;  %3795 = vmatprep.mubr.msk.bf16.mxu0 %vm4347_vm0, %v5996_v24  ;;  %v4218_v4 = vld [vmem:[%s5994_s0 + $0x2b4] ss:$20 sps:$4 sm:$0xff]  }
 0x17b   :  { %v2123_v41 = vpop.f32.mrf.mxu0  ;;  %v2323_v31 = vpop.f32.mrf.mxu1 }
 0x17d   :  { %v5132_v12 = vpop.f32.mrf.mxu0  ;;  %v5134_v2 = vpop.f32.mrf.mxu1 }
 0x17e   :  { %6029 = vst [vmem:[#allocation33_spill] sm:$0xff] %v5134_v2 }
 0x17f   :  { %v2126_v56 = vpop.f32.mrf.mxu0  ;;  %v2326_v15 = vpop.f32.mrf.mxu1 }
 0x180   :  { %v4216_v56 = vld [vmem:[%s5994_s0 + $0x2b0] ss:$20 sps:$4 sm:$0xff]  }
 0x181   :  { %v5145_v41 = vpop.f32.mrf.mxu0  ;;  %v5147_v31 = vpop.f32.mrf.mxu1  ;;  %2553 = vmatmul.mubr.bf16.gmra.mxu1 %v4212_v59  ;;  %3796 = vmatmul.mubr.msk.bf16.gmra.mxu0 %vm1819_vm1, %v4215_v3  ;;  %v4219_v59 = vld [vmem:[%s5994_s0 + $0x290] ss:$20 sps:$4 sm:$0xff]  }
 0x182   :  { %6030 = vst [vmem:[#allocation34_spill] sm:$0xff] %v5147_v31  ;;  %2560 = vmatprep.mubr.bf16.mxu1 %v4218_v4  ;;  %3799 = vmatprep.mubr.msk.bf16.mxu0 %vm4347_vm0, %v5996_v24  ;;  %v4222_v3 = vld [vmem:[%s5994_s0 + $0x2dc] ss:$20 sps:$4 sm:$0xff]  }
 0x183   :  { %v2131_v2 = vpop.f32.mrf.mxu0  ;;  %v2331_v22 = vpop.f32.mrf.mxu1 }
 0x185   :  { %v5152_v48 = vpop.f32.mrf.mxu0  ;;  %v5154_v34 = vpop.f32.mrf.mxu1 }
 0x186   :  { %6031 = vst [vmem:[#allocation35_spill] sm:$0xff] %v5154_v34 }
 0x187   :  { %v2134_v4 = vpop.f32.mrf.mxu0  ;;  %v2334_v15 = vpop.f32.mrf.mxu1 }
 0x188   :  { %v4220_v4 = vld [vmem:[%s5994_s0 + $0x2d8] ss:$20 sps:$4 sm:$0xff]  }
 0x189   :  { %v5165_v2 = vpop.f32.mrf.mxu0  ;;  %v5167_v22 = vpop.f32.mrf.mxu1  ;;  %2561 = vmatmul.mubr.bf16.gmra.mxu1 %v4216_v56  ;;  %3800 = vmatmul.mubr.msk.bf16.gmra.mxu0 %vm1819_vm1, %v4219_v59  ;;  %v4223_v56 = vld [vmem:[%s5994_s0 + $0x2b8] ss:$20 sps:$4 sm:$0xff]  }
 0x18a   :  { %6032 = vst [vmem:[#allocation36_spill] sm:$0xff] %v5167_v22  ;;  %2568 = vmatprep.mubr.bf16.mxu1 %v4222_v3  ;;  %3803 = vmatprep.mubr.msk.bf16.mxu0 %vm4347_vm0, %v5996_v24  ;;  %v4226_v59 = vld [vmem:[%s5994_s0 + $0x304] ss:$20 sps:$4 sm:$0xff]  }
 0x18b   :  { %v2139_v34 = vpop.f32.mrf.mxu0  ;;  %v2339_v31 = vpop.f32.mrf.mxu1 }
 0x18d   :  { %v5172_v18 = vpop.f32.mrf.mxu0  ;;  %v5174_v11 = vpop.f32.mrf.mxu1 }
 0x18e   :  { %6033 = vst [vmem:[#allocation37_spill] sm:$0xff] %v5174_v11 }
 0x18f   :  { %v2142_v3 = vpop.f32.mrf.mxu0  ;;  %v2342_v15 = vpop.f32.mrf.mxu1 }
 0x190   :  { %v4224_v3 = vld [vmem:[%s5994_s0 + $0x300] ss:$20 sps:$4 sm:$0xff]  }
 0x191   :  { %v5185_v34 = vpop.f32.mrf.mxu0  ;;  %v5187_v31 = vpop.f32.mrf.mxu1  ;;  %2569 = vmatmul.mubr.bf16.gmra.mxu1 %v4220_v4  ;;  %3804 = vmatmul.mubr.msk.bf16.gmra.mxu0 %vm1819_vm1, %v4223_v56  ;;  %v4227_v4 = vld [vmem:[%s5994_s0 + $0x2e0] ss:$20 sps:$4 sm:$0xff]  }
 0x192   :  { %6034 = vst [vmem:[#allocation38_spill] sm:$0xff] %v5187_v31  ;;  %2576 = vmatprep.mubr.bf16.mxu1 %v4226_v59  ;;  %3807 = vmatprep.mubr.msk.bf16.mxu0 %vm4347_vm0, %v5996_v24  ;;  %v4230_v56 = vld [vmem:[%s5994_s0 + $0x32c] ss:$20 sps:$4 sm:$0xff]  }
 0x193   :  { %v2147_v11 = vpop.f32.mrf.mxu0  ;;  %v2347_v22 = vpop.f32.mrf.mxu1 }
 0x195   :  { %v5192_v63 = vpop.f32.mrf.mxu0  ;;  %v5194_v55 = vpop.f32.mrf.mxu1 }
 0x196   :  { %6035 = vst [vmem:[#allocation39_spill] sm:$0xff] %v5194_v55 }
 0x197   :  { %v2150_v59 = vpop.f32.mrf.mxu0  ;;  %v2350_v15 = vpop.f32.mrf.mxu1 }
 0x198   :  { %v4228_v59 = vld [vmem:[%s5994_s0 + $0x328] ss:$20 sps:$4 sm:$0xff]  }
 0x199   :  { %v5205_v11 = vpop.f32.mrf.mxu0  ;;  %v5207_v22 = vpop.f32.mrf.mxu1  ;;  %2577 = vmatmul.mubr.bf16.gmra.mxu1 %v4224_v3  ;;  %3808 = vmatmul.mubr.msk.bf16.gmra.mxu0 %vm1819_vm1, %v4227_v4  ;;  %v4231_v3 = vld [vmem:[%s5994_s0 + $0x308] ss:$20 sps:$4 sm:$0xff]  }
 0x19a   :  { %6036 = vst [vmem:[#allocation40_spill] sm:$0xff] %v5207_v22  ;;  %2584 = vmatprep.mubr.bf16.mxu1 %v4230_v56  ;;  %3811 = vmatprep.mubr.msk.bf16.mxu0 %vm4347_vm0, %v5996_v24  ;;  %v4234_v4 = vld [vmem:[%s5994_s0 + $0x354] ss:$20 sps:$4 sm:$0xff]  }
 0x19b   :  { %v2155_v55 = vpop.f32.mrf.mxu0  ;;  %v2355_v31 = vpop.f32.mrf.mxu1 }
 0x19d   :  { %v5212_v44 = vpop.f32.mrf.mxu0  ;;  %v5214_v38 = vpop.f32.mrf.mxu1 }
 0x19e   :  { %6037 = vst [vmem:[#allocation41_spill] sm:$0xff] %v5214_v38 }
 0x19f   :  { %v2158_v56 = vpop.f32.mrf.mxu0  ;;  %v2358_v15 = vpop.f32.mrf.mxu1 }
 0x1a0   :  { %v4232_v56 = vld [vmem:[%s5994_s0 + $0x350] ss:$20 sps:$4 sm:$0xff]  }
 0x1a1   :  { %v5225_v55 = vpop.f32.mrf.mxu0  ;;  %v5227_v31 = vpop.f32.mrf.mxu1  ;;  %2585 = vmatmul.mubr.bf16.gmra.mxu1 %v4228_v59  ;;  %3812 = vmatmul.mubr.msk.bf16.gmra.mxu0 %vm1819_vm1, %v4231_v3  ;;  %v4235_v59 = vld [vmem:[%s5994_s0 + $0x330] ss:$20 sps:$4 sm:$0xff]  }
 0x1a2   :  { %6038 = vst [vmem:[#allocation42_spill] sm:$0xff] %v5227_v31  ;;  %2592 = vmatprep.mubr.bf16.mxu1 %v4234_v4  ;;  %3815 = vmatprep.mubr.msk.bf16.mxu0 %vm4347_vm0, %v5996_v24  ;;  %v4238_v3 = vld [vmem:[%s5994_s0 + $0x37c] ss:$20 sps:$4 sm:$0xff]  }
 0x1a3   :  { %v2163_v38 = vpop.f32.mrf.mxu0  ;;  %v2363_v22 = vpop.f32.mrf.mxu1 }
 0x1a5   :  { %v5232_v27 = vpop.f32.mrf.mxu0  ;;  %v5234_v20 = vpop.f32.mrf.mxu1 }
 0x1a6   :  { %6039 = vst [vmem:[#allocation43_spill] sm:$0xff] %v5234_v20 }
 0x1a7   :  { %v2166_v4 = vpop.f32.mrf.mxu0  ;;  %v2366_v15 = vpop.f32.mrf.mxu1 }
 0x1a8   :  { %v4236_v4 = vld [vmem:[%s5994_s0 + $0x378] ss:$20 sps:$4 sm:$0xff]  }
 0x1a9   :  { %v5245_v38 = vpop.f32.mrf.mxu0  ;;  %v5247_v22 = vpop.f32.mrf.mxu1  ;;  %2593 = vmatmul.mubr.bf16.gmra.mxu1 %v4232_v56  ;;  %3816 = vmatmul.mubr.msk.bf16.gmra.mxu0 %vm1819_vm1, %v4235_v59  ;;  %v4239_v56 = vld [vmem:[%s5994_s0 + $0x358] ss:$20 sps:$4 sm:$0xff]  }
 0x1aa   :  { %6040 = vst [vmem:[#allocation44_spill] sm:$0xff] %v5247_v22  ;;  %2600 = vmatprep.mubr.bf16.mxu1 %v4238_v3  ;;  %3819 = vmatprep.mubr.msk.bf16.mxu0 %vm4347_vm0, %v5996_v24  ;;  %v4242_v59 = vld [vmem:[%s5994_s0 + $0x3a4] ss:$20 sps:$4 sm:$0xff]  }
 0x1ab   :  { %v2171_v20 = vpop.f32.mrf.mxu0  ;;  %v2371_v31 = vpop.f32.mrf.mxu1 }
 0x1ad   :  { %v5252_v10 = vpop.f32.mrf.mxu0  ;;  %v5254_v6 = vpop.f32.mrf.mxu1 }
 0x1ae   :  { %6041 = vst [vmem:[#allocation45_spill] sm:$0xff] %v5254_v6 }
 0x1af   :  { %v2174_v3 = vpop.f32.mrf.mxu0  ;;  %v2374_v15 = vpop.f32.mrf.mxu1 }
 0x1b0   :  { %v4240_v3 = vld [vmem:[%s5994_s0 + $0x3a0] ss:$20 sps:$4 sm:$0xff]  }
 0x1b1   :  { %v5265_v20 = vpop.f32.mrf.mxu0  ;;  %v5267_v31 = vpop.f32.mrf.mxu1  ;;  %2601 = vmatmul.mubr.bf16.gmra.mxu1 %v4236_v4  ;;  %3820 = vmatmul.mubr.msk.bf16.gmra.mxu0 %vm1819_vm1, %v4239_v56  ;;  %v4243_v4 = vld [vmem:[%s5994_s0 + $0x380] ss:$20 sps:$4 sm:$0xff]  }
 0x1b2   :  { %6042 = vst [vmem:[#allocation46_spill] sm:$0xff] %v5267_v31  ;;  %2608 = vmatprep.mubr.bf16.mxu1 %v4242_v59  ;;  %3823 = vmatprep.mubr.msk.bf16.mxu0 %vm4347_vm0, %v5996_v24  ;;  %v4246_v56 = vld [vmem:[%s5994_s0 + $0x3cc] ss:$20 sps:$4 sm:$0xff]  }
 0x1b3   :  { %v2179_v6 = vpop.f32.mrf.mxu0  ;;  %v2379_v22 = vpop.f32.mrf.mxu1 }
 0x1b5   :  { %v5272_v62 = vpop.f32.mrf.mxu0  ;;  %v5274_v58 = vpop.f32.mrf.mxu1 }
 0x1b6   :  { %6043 = vst [vmem:[#allocation47_spill] sm:$0xff] %v5274_v58 }
 0x1b7   :  { %v2182_v59 = vpop.f32.mrf.mxu0  ;;  %v2382_v15 = vpop.f32.mrf.mxu1 }
 0x1b8   :  { %v4244_v59 = vld [vmem:[%s5994_s0 + $0x3c8] ss:$20 sps:$4 sm:$0xff]  }
 0x1b9   :  { %v5285_v6 = vpop.f32.mrf.mxu0  ;;  %v5287_v22 = vpop.f32.mrf.mxu1  ;;  %2609 = vmatmul.mubr.bf16.gmra.mxu1 %v4240_v3  ;;  %3824 = vmatmul.mubr.msk.bf16.gmra.mxu0 %vm1819_vm1, %v4243_v4  ;;  %v4247_v3 = vld [vmem:[%s5994_s0 + $0x3a8] ss:$20 sps:$4 sm:$0xff]  }
 0x1ba   :  { %6044 = vst [vmem:[#allocation48_spill] sm:$0xff] %v5287_v22  ;;  %2616 = vmatprep.mubr.bf16.mxu1 %v4246_v56  ;;  %3827 = vmatprep.mubr.msk.bf16.mxu0 %vm4347_vm0, %v5996_v24  ;;  %v4250_v4 = vld [vmem:[%s5994_s0 + $0x3f4] ss:$20 sps:$4 sm:$0xff]  }
 0x1bb   :  { %v2187_v58 = vpop.f32.mrf.mxu0  ;;  %v2387_v31 = vpop.f32.mrf.mxu1 }
 0x1bd   :  { %v5292_v51 = vpop.f32.mrf.mxu0  ;;  %v5294_v47 = vpop.f32.mrf.mxu1 }
 0x1be   :  { %6045 = vst [vmem:[#allocation49_spill] sm:$0xff] %v5294_v47 }
 0x1bf   :  { %v2190_v56 = vpop.f32.mrf.mxu0  ;;  %v2390_v15 = vpop.f32.mrf.mxu1 }
 0x1c0   :  { %v4248_v56 = vld [vmem:[%s5994_s0 + $0x3f0] ss:$20 sps:$4 sm:$0xff]  }
 0x1c1   :  { %v5305_v58 = vpop.f32.mrf.mxu0  ;;  %v2426_v31 = vpop.f32.mrf.mxu1  ;;  %2617 = vmatmul.mubr.bf16.gmra.mxu1 %v4244_v59  ;;  %3828 = vmatmul.mubr.msk.bf16.gmra.mxu0 %vm1819_vm1, %v4247_v3  ;;  %v4251_v15 = vld [vmem:[%s5994_s0 + $0x3d0] ss:$20 sps:$4 sm:$0xff]  }
 0x1c2   :  { %2624 = vmatprep.mubr.bf16.mxu1 %v4250_v4  ;;  %3831 = vmatprep.mubr.msk.bf16.mxu0 %vm4347_vm0, %v5996_v24  ;;  %v4254_v59 = vld [vmem:[%s5994_s0 + $0x41c] ss:$20 sps:$4 sm:$0xff]  }
 0x1c3   :  { %v2195_v47 = vpop.f32.mrf.mxu0  ;;  %v2428_v22 = vpop.f32.mrf.mxu1 }
 0x1c4   :  { %v2427_v47 = vadd.f32 %v2426_v31, %v4826_v13  ;;  %v4252_v31 = vld [vmem:[%s5994_s0 + $0x418] ss:$20 sps:$4 sm:$0xff]  }
 0x1c5   :  { %v5310_v40 = vpop.f32.mrf.mxu0  ;;  %v2429_v36 = vpop.f32.mrf.mxu1 }
 0x1c6   :  { %6046 = vst [vmem:[#allocation50_spill] sm:$0xff] %v5310_v40  ;;  %v2430_v40 = vadd.f32 %v2429_v36, %v4832_v16 }
 0x1c7   :  { %v2198_v3 = vpop.f32.mrf.mxu0  ;;  %v2431_v4 = vpop.f32.mrf.mxu1 }
 0x1c9   :  { %v2434_v22 = vpop.f32.mrf.mxu1  ;;  %2625 = vmatmul.mubr.bf16.gmra.mxu1 %v4248_v56  ;;  %v2851_v24 = vpop.f32.mrf.mxu0  ;;  %3832 = vmatmul.mubr.msk.bf16.gmra.mxu0 %vm1819_vm1, %v4251_v15 }
 0x1ca   :  { %v2852_v29 = vadd.f32 %v2851_v24, %v2427_v47  ;;  %2632 = vmatprep.mubr.bf16.mxu1 %v4254_v59  ;;  %3835 = vmatprep.mubr.msk.bf16.mxu0 %vm4347_vm0, %v6047_v25  ;;  %v4255_v24 = vld [vmem:[%s5994_s0 + $0x3f8] ss:$20 sps:$4 sm:$0xff]   ;;  %v2435_v36 = vadd.f32 %v2434_v22, %v4845_v23 }
 0x1cb   :  { %v2436_v17 = vpop.f32.mrf.mxu1  ;;  %v3737_v14 = vpop.f32.mrf.mxu0 }
 0x1cc   :  { %3242 = vst [vmem:[%s5995_s2] sm:$0xff] %v2852_v29  ;;  %v4258_v14 = vld [vmem:[%s5994_s0 + $0x444] ss:$20 sps:$4 sm:$0xff]  }
 0x1cd   :  { %v2437_v3 = vpop.f32.mrf.mxu1  ;;  %v2854_v13 = vpop.f32.mrf.mxu0 }
 0x1ce   :  { %v2855_v56 = vadd.f32 %v2854_v13, %v2430_v40  ;;  %v2438_v47 = vadd.f32 %v2437_v3, %v4852_v28  ;;  %v4256_v13 = vld [vmem:[%s5994_s0 + $0x440] ss:$20 sps:$4 sm:$0xff]  }
 0x1cf   :  { %v2439_v16 = vpop.f32.mrf.mxu1  ;;  %v3738_v17 = vpop.f32.mrf.mxu0 }
 0x1d0   :  { %3243 = vst [vmem:[%s5995_s2 + $0x8] sm:$0xff] %v2855_v56  ;;  %v4262_v56 = vld [vmem:[%s5994_s0 + $0x46c] ss:$20 sps:$4 sm:$0xff]  }
 0x1d1   :  { %v2442_v29 = vpop.f32.mrf.mxu1  ;;  %2633 = vmatmul.mubr.bf16.gmra.mxu1 %v4252_v31  ;;  %v2859_v15 = vpop.f32.mrf.mxu0  ;;  %3836 = vmatmul.mubr.msk.bf16.gmra.mxu0 %vm1819_vm1, %v4255_v24  ;;  %v4259_v31 = vld [vmem:[%s5994_s0 + $0x420] ss:$20 sps:$4 sm:$0xff]  }
 0x1d2   :  { %v2860_v59 = vadd.f32 %v2859_v15, %v2435_v36  ;;  %2640 = vmatprep.mubr.bf16.mxu1 %v4258_v14  ;;  %3839 = vmatprep.mubr.msk.bf16.mxu0 %vm4347_vm0, %v6047_v25  ;;  %v2443_v14 = vadd.f32 %v2442_v29, %v4865_v35 }
 0x1d3   :  { %v2444_v40 = vpop.f32.mrf.mxu1  ;;  %v3741_v4 = vpop.f32.mrf.mxu0 }
 0x1d4   :  { %3244 = vst [vmem:[%s5995_s2 + $0x10] sm:$0xff] %v2860_v59  ;;  %v4260_v4 = vld [vmem:[%s5994_s0 + $0x468] ss:$20 sps:$4 sm:$0xff]  }
 0x1d5   :  { %v2445_v23 = vpop.f32.mrf.mxu1  ;;  %v2862_v22 = vpop.f32.mrf.mxu0 }
 0x1d6   :  { %v2863_v24 = vadd.f32 %v2862_v22, %v2438_v47  ;;  %v2446_v40 = vadd.f32 %v2445_v23, %v4872_v39  ;;  %v4263_v47 = vld [vmem:[%s5994_s0 + $0x448] ss:$20 sps:$4 sm:$0xff]  }
 0x1d7   :  { %v2447_v28 = vpop.f32.mrf.mxu1  ;;  %v3742_v3 = vpop.f32.mrf.mxu0 }
 0x1d8   :  { %3245 = vst [vmem:[%s5995_s2 + $0x18] sm:$0xff] %v2863_v24 }
 0x1d9   :  { %v2450_v16 = vpop.f32.mrf.mxu1  ;;  %2641 = vmatmul.mubr.bf16.gmra.mxu1 %v4256_v13  ;;  %v2867_v17 = vpop.f32.mrf.mxu0  ;;  %3840 = vmatmul.mubr.msk.bf16.gmra.mxu0 %vm1819_vm1, %v4259_v31  ;;  %v4266_v13 = vld [vmem:[%s5994_s0 + $0x494] ss:$20 sps:$4 sm:$0xff]  }
 0x1da   :  { %v2868_v36 = vadd.f32 %v2867_v17, %v2443_v14  ;;  %2648 = vmatprep.mubr.bf16.mxu1 %v4262_v56  ;;  %3843 = vmatprep.mubr.msk.bf16.mxu0 %vm4347_vm0, %v6047_v25  ;;  %v2451_v31 = vadd.f32 %v2450_v16, %v4885_v46 }
 0x1db   :  { %v2452_v15 = vpop.f32.mrf.mxu1  ;;  %v3745_v59 = vpop.f32.mrf.mxu0 }
 0x1dc   :  { %3246 = vst [vmem:[%s5995_s2 + $0x20] sm:$0xff] %v2868_v36  ;;  %v4264_v36 = vld [vmem:[%s5994_s0 + $0x490] ss:$20 sps:$4 sm:$0xff]  }
 0x1dd   :  { %v2453_v35 = vpop.f32.mrf.mxu1  ;;  %v2870_v29 = vpop.f32.mrf.mxu0  ;;  %v4267_v15 = vld [vmem:[%s5994_s0 + $0x470] ss:$20 sps:$4 sm:$0xff]  }
 0x1de   :  { %v2871_v22 = vadd.f32 %v2870_v29, %v2446_v40  ;;  %v2454_v17 = vadd.f32 %v2453_v35, %v4892_v50  ;;  %v4270_v40 = vld [vmem:[%s5994_s0 + $0x4bc] ss:$20 sps:$4 sm:$0xff]  }
 0x1df   :  { %v2455_v39 = vpop.f32.mrf.mxu1  ;;  %v3746_v23 = vpop.f32.mrf.mxu0 }
 0x1e0   :  { %3247 = vst [vmem:[%s5995_s2 + $0x28] sm:$0xff] %v2871_v22 }
 0x1e1   :  { %v2458_v24 = vpop.f32.mrf.mxu1  ;;  %2649 = vmatmul.mubr.bf16.gmra.mxu1 %v4260_v4  ;;  %v2875_v56 = vpop.f32.mrf.mxu0  ;;  %3844 = vmatmul.mubr.msk.bf16.gmra.mxu0 %vm1819_vm1, %v4263_v47 }
 0x1e2   :  { %v2876_v28 = vadd.f32 %v2875_v56, %v2451_v31  ;;  %2656 = vmatprep.mubr.bf16.mxu1 %v4266_v13  ;;  %3847 = vmatprep.mubr.msk.bf16.mxu0 %vm4347_vm0, %v6047_v25  ;;  %v2459_v29 = vadd.f32 %v2458_v24, %v4905_v57  ;;  %v4268_v24 = vld [vmem:[%s5994_s0 + $0x4b8] ss:$20 sps:$4 sm:$0xff]  }
 0x1e3   :  { %v2460_v3 = vpop.f32.mrf.mxu1  ;;  %v3749_v14 = vpop.f32.mrf.mxu0  ;;  %v4271_v56 = vld [vmem:[%s5994_s0 + $0x498] ss:$20 sps:$4 sm:$0xff]  }
 0x1e4   :  { %3248 = vst [vmem:[%s5995_s2 + $0x30] sm:$0xff] %v2876_v28  ;;  %v4274_v3 = vld [vmem:[%s5994_s0 + $0x4e4] ss:$20 sps:$4 sm:$0xff]  }
 0x1e5   :  { %v2461_v46 = vpop.f32.mrf.mxu1  ;;  %v2878_v16 = vpop.f32.mrf.mxu0 }
 0x1e6   :  { %v2879_v59 = vadd.f32 %v2878_v16, %v2454_v17  ;;  %v2462_v23 = vadd.f32 %v2461_v46, %v4912_v61 }
 0x1e7   :  { %v2463_v50 = vpop.f32.mrf.mxu1  ;;  %v3750_v35 = vpop.f32.mrf.mxu0 }
 0x1e8   :  { %3249 = vst [vmem:[%s5995_s2 + $0x38] sm:$0xff] %v2879_v59  ;;  %v4272_v35 = vld [vmem:[%s5994_s0 + $0x4e0] ss:$20 sps:$4 sm:$0xff]  }
 0x1e9   :  { %v2466_v4 = vpop.f32.mrf.mxu1  ;;  %2657 = vmatmul.mubr.bf16.gmra.mxu1 %v4264_v36  ;;  %v2883_v47 = vpop.f32.mrf.mxu0  ;;  %3848 = vmatmul.mubr.msk.bf16.gmra.mxu0 %vm1819_vm1, %v4267_v15 }
 0x1ea   :  { %v2884_v22 = vadd.f32 %v2883_v47, %v2459_v29  ;;  %2664 = vmatprep.mubr.bf16.mxu1 %v4270_v40  ;;  %3851 = vmatprep.mubr.msk.bf16.mxu0 %vm4347_vm0, %v6047_v25  ;;  %v2467_v17 = vadd.f32 %v2466_v4, %v4925_v5  ;;  %v4275_v29 = vld [vmem:[%s5994_s0 + $0x4c0] ss:$20 sps:$4 sm:$0xff]  }
 0x1eb   :  { %v2468_v13 = vpop.f32.mrf.mxu1  ;;  %v3753_v39 = vpop.f32.mrf.mxu0  ;;  %v4278_v47 = vld [vmem:[%s5994_s0 + $0x50c] ss:$20 sps:$4 sm:$0xff]  }
 0x1ec   :  { %3250 = vst [vmem:[%s5995_s2 + $0x40] sm:$0xff] %v2884_v22 }
 0x1ed   :  { %v2469_v57 = vpop.f32.mrf.mxu1  ;;  %v2886_v31 = vpop.f32.mrf.mxu0 }
 0x1ee   :  { %v2887_v28 = vadd.f32 %v2886_v31, %v2462_v23  ;;  %v2470_v40 = vadd.f32 %v2469_v57, %v4932_v9 }
 0x1ef   :  { %v2471_v61 = vpop.f32.mrf.mxu1  ;;  %v3754_v14 = vpop.f32.mrf.mxu0 }
 0x1f0   :  { %3251 = vst [vmem:[%s5995_s2 + $0x48] sm:$0xff] %v2887_v28  ;;  %v4279_v61 = vld [vmem:[%s5994_s0 + $0x4e8] ss:$20 sps:$4 sm:$0xff]  }
 0x1f1   :  { %v2474_v46 = vpop.f32.mrf.mxu1  ;;  %2665 = vmatmul.mubr.bf16.gmra.mxu1 %v4268_v24  ;;  %v2891_v16 = vpop.f32.mrf.mxu0  ;;  %3852 = vmatmul.mubr.msk.bf16.gmra.mxu0 %vm1819_vm1, %v4271_v56 }
 0x1f2   :  { %v2892_v36 = vadd.f32 %v2891_v16, %v2467_v17  ;;  %2672 = vmatprep.mubr.bf16.mxu1 %v4274_v3  ;;  %3855 = vmatprep.mubr.msk.bf16.mxu0 %vm4347_vm0, %v6047_v25  ;;  %v2475_v13 = vadd.f32 %v2474_v46, %v4945_v19  ;;  %v4276_v3 = vld [vmem:[%s5994_s0 + $0x508] ss:$20 sps:$4 sm:$0xff]  }
 0x1f3   :  { %v2476_v15 = vpop.f32.mrf.mxu1  ;;  %v3757_v59 = vpop.f32.mrf.mxu0  ;;  %v4282_v17 = vld [vmem:[%s5994_s0 + $0x534] ss:$20 sps:$4 sm:$0xff]  }
 0x1f4   :  { %3252 = vst [vmem:[%s5995_s2 + $0x50] sm:$0xff] %v2892_v36 }
 0x1f5   :  { %v2477_v5 = vpop.f32.mrf.mxu1  ;;  %v2894_v50 = vpop.f32.mrf.mxu0 }
 0x1f6   :  { %v2895_v4 = vadd.f32 %v2894_v50, %v2470_v40  ;;  %v2478_v56 = vadd.f32 %v2477_v5, %v4952_v26 }
 0x1f7   :  { %v2479_v9 = vpop.f32.mrf.mxu1  ;;  %v3758_v22 = vpop.f32.mrf.mxu0 }
 0x1f8   :  { %3253 = vst [vmem:[%s5995_s2 + $0x58] sm:$0xff] %v2895_v4  ;;  %v4283_v4 = vld [vmem:[%s5994_s0 + $0x510] ss:$20 sps:$4 sm:$0xff]  }
 0x1f9   :  { %v2482_v39 = vpop.f32.mrf.mxu1  ;;  %2673 = vmatmul.mubr.bf16.gmra.mxu1 %v4272_v35  ;;  %v2899_v23 = vpop.f32.mrf.mxu0  ;;  %3856 = vmatmul.mubr.msk.bf16.gmra.mxu0 %vm1819_vm1, %v4275_v29  ;;  %v4280_v29 = vld [vmem:[%s5994_s0 + $0x530] ss:$20 sps:$4 sm:$0xff]  }
 0x1fa   :  { %v2900_v57 = vadd.f32 %v2899_v23, %v2475_v13  ;;  %2680 = vmatprep.mubr.bf16.mxu1 %v4278_v47  ;;  %3859 = vmatprep.mubr.msk.bf16.mxu0 %vm4347_vm0, %v6047_v25  ;;  %v2483_v16 = vadd.f32 %v2482_v39, %v4965_v37  ;;  %v4286_v9 = vld [vmem:[%s5994_s0 + $0x55c] ss:$20 sps:$4 sm:$0xff]  }
 0x1fb   :  { %v2484_v31 = vpop.f32.mrf.mxu1  ;;  %v3761_v24 = vpop.f32.mrf.mxu0 }
 0x1fc   :  { %3254 = vst [vmem:[%s5995_s2 + $0x60] sm:$0xff] %v2900_v57 }
 0x1fd   :  { %v2485_v19 = vpop.f32.mrf.mxu1  ;;  %v2902_v28 = vpop.f32.mrf.mxu0 }
 0x1fe   :  { %v2903_v14 = vadd.f32 %v2902_v28, %v2478_v56  ;;  %v2486_v50 = vadd.f32 %v2485_v19, %v4972_v43  ;;  %v4284_v28 = vld [vmem:[%s5994_s0 + $0x558] ss:$20 sps:$4 sm:$0xff]  }
 0x1ff   :  { %v2487_v26 = vpop.f32.mrf.mxu1  ;;  %v3762_v46 = vpop.f32.mrf.mxu0 }
 0x200   :  { %3255 = vst [vmem:[%s5995_s2 + $0x68] sm:$0xff] %v2903_v14  ;;  %v4290_v14 = vld [vmem:[%s5994_s0 + $0x584] ss:$20 sps:$4 sm:$0xff]  }
 0x201   :  { %v2490_v36 = vpop.f32.mrf.mxu1  ;;  %2681 = vmatmul.mubr.bf16.gmra.mxu1 %v4276_v3  ;;  %v2907_v15 = vpop.f32.mrf.mxu0  ;;  %3860 = vmatmul.mubr.msk.bf16.gmra.mxu0 %vm1819_vm1, %v4279_v61  ;;  %v4287_v3 = vld [vmem:[%s5994_s0 + $0x538] ss:$20 sps:$4 sm:$0xff]  }
 0x202   :  { %v2908_v59 = vadd.f32 %v2907_v15, %v2483_v16  ;;  %2688 = vmatprep.mubr.bf16.mxu1 %v4282_v17  ;;  %3863 = vmatprep.mubr.msk.bf16.mxu0 %vm4347_vm0, %v6047_v25  ;;  %v2491_v13 = vadd.f32 %v2490_v36, %v4985_v54 }
 0x203   :  { %v2492_v40 = vpop.f32.mrf.mxu1  ;;  %v3765_v5 = vpop.f32.mrf.mxu0 }
 0x204   :  { %3256 = vst [vmem:[%s5995_s2 + $0x70] sm:$0xff] %v2908_v59 }
 0x205   :  { %v2493_v37 = vpop.f32.mrf.mxu1  ;;  %v2910_v35 = vpop.f32.mrf.mxu0 }
 0x206   :  { %v2911_v47 = vadd.f32 %v2910_v35, %v2486_v50  ;;  %v2494_v56 = vadd.f32 %v2493_v37, %v4992_v60  ;;  %v4288_v50 = vld [vmem:[%s5994_s0 + $0x580] ss:$20 sps:$4 sm:$0xff]  }
 0x207   :  { %v2495_v43 = vpop.f32.mrf.mxu1  ;;  %v3766_v22 = vpop.f32.mrf.mxu0  ;;  %v4291_v37 = vld [vmem:[%s5994_s0 + $0x560] ss:$20 sps:$4 sm:$0xff]  }
 0x208   :  { %3257 = vst [vmem:[%s5995_s2 + $0x78] sm:$0xff] %v2911_v47 }
 0x209   :  { %v2498_v39 = vpop.f32.mrf.mxu1  ;;  %2689 = vmatmul.mubr.bf16.gmra.mxu1 %v4280_v29  ;;  %v2915_v23 = vpop.f32.mrf.mxu0  ;;  %3864 = vmatmul.mubr.msk.bf16.gmra.mxu0 %vm1819_vm1, %v4283_v4  ;;  %v4294_v29 = vld [vmem:[%s5994_s0 + $0x5ac] ss:$20 sps:$4 sm:$0xff]  }
 0x20a   :  { %v2916_v57 = vadd.f32 %v2915_v23, %v2491_v13  ;;  %2696 = vmatprep.mubr.bf16.mxu1 %v4286_v9  ;;  %3867 = vmatprep.mubr.msk.bf16.mxu0 %vm4347_vm0, %v6047_v25  ;;  %v2499_v26 = vadd.f32 %v2498_v39, %v5005_v8 }
 0x20b   :  { %v2500_v31 = vpop.f32.mrf.mxu1  ;;  %v3769_v24 = vpop.f32.mrf.mxu0 }
 0x20c   :  { %3258 = vst [vmem:[%s5995_s2 + $0x80] sm:$0xff] %v2916_v57  ;;  %v4292_v31 = vld [vmem:[%s5994_s0 + $0x5a8] ss:$20 sps:$4 sm:$0xff]  }
 0x20d   :  { %v2501_v54 = vpop.f32.mrf.mxu1  ;;  %v2918_v19 = vpop.f32.mrf.mxu0  ;;  %v4295_v24 = vld [vmem:[%s5994_s0 + $0x588] ss:$20 sps:$4 sm:$0xff]  }
 0x20e   :  { %v2919_v61 = vadd.f32 %v2918_v19, %v2494_v56  ;;  %v2502_v40 = vadd.f32 %v2501_v54, %v5012_v0  ;;  %v4298_v54 = vld [vmem:[%s5994_s0 + $0x5d4] ss:$20 sps:$4 sm:$0xff]  }
 0x20f   :  { %v2503_v60 = vpop.f32.mrf.mxu1  ;;  %v3770_v17 = vpop.f32.mrf.mxu0 }
 0x210   :  { %3259 = vst [vmem:[%s5995_s2 + $0x88] sm:$0xff] %v2919_v61 }
 0x211   :  { %v2506_v46 = vpop.f32.mrf.mxu1  ;;  %2697 = vmatmul.mubr.bf16.gmra.mxu1 %v4284_v28  ;;  %v2923_v16 = vpop.f32.mrf.mxu0  ;;  %3868 = vmatmul.mubr.msk.bf16.gmra.mxu0 %vm1819_vm1, %v4287_v3 }
 0x212   :  { %v2924_v36 = vadd.f32 %v2923_v16, %v2499_v26  ;;  %2704 = vmatprep.mubr.bf16.mxu1 %v4290_v14  ;;  %3871 = vmatprep.mubr.msk.bf16.mxu0 %vm4347_vm0, %v6047_v25  ;;  %v2507_v47 = vadd.f32 %v2506_v46, %v5025_v33  ;;  %v4296_v16 = vld [vmem:[%s5994_s0 + $0x5d0] ss:$20 sps:$4 sm:$0xff]  }
 0x213   :  { %v2508_v15 = vpop.f32.mrf.mxu1  ;;  %v3773_v59 = vpop.f32.mrf.mxu0 }
 0x214   :  { %3260 = vst [vmem:[%s5995_s2 + $0x90] sm:$0xff] %v2924_v36  ;;  %v4299_v36 = vld [vmem:[%s5994_s0 + $0x5b0] ss:$20 sps:$4 sm:$0xff]  }
 0x215   :  { %v2509_v8 = vpop.f32.mrf.mxu1  ;;  %v2926_v5 = vpop.f32.mrf.mxu0  ;;  %v4302_v59 = vld [vmem:[%s5994_s0 + $0x5fc] ss:$20 sps:$4 sm:$0xff]  }
 0x216   :  { %v2927_v35 = vadd.f32 %v2926_v5, %v2502_v40  ;;  %v2510_v23 = vadd.f32 %v2509_v8, %v5032_v45 }
 0x217   :  { %v2511_v0 = vpop.f32.mrf.mxu1  ;;  %v3774_v4 = vpop.f32.mrf.mxu0 }
 0x218   :  { %3261 = vst [vmem:[%s5995_s2 + $0x98] sm:$0xff] %v2927_v35 }
 0x219   :  { %v2514_v9 = vpop.f32.mrf.mxu1  ;;  %2705 = vmatmul.mubr.bf16.gmra.mxu1 %v4288_v50  ;;  %v2931_v43 = vpop.f32.mrf.mxu0  ;;  %3872 = vmatmul.mubr.msk.bf16.gmra.mxu0 %vm1819_vm1, %v4291_v37 }
 0x21a   :  { %v2932_v22 = vadd.f32 %v2931_v43, %v2507_v47  ;;  %2712 = vmatprep.mubr.bf16.mxu1 %v4294_v29  ;;  %3875 = vmatprep.mubr.msk.bf16.mxu0 %vm4347_vm0, %v6047_v25  ;;  %v2515_v28 = vadd.f32 %v2514_v9, %v5045_v1  ;;  %v4300_v47 = vld [vmem:[%s5994_s0 + $0x5f8] ss:$20 sps:$4 sm:$0xff]  }
 0x21b   :  { %v2516_v13 = vpop.f32.mrf.mxu1  ;;  %v3777_v39 = vpop.f32.mrf.mxu0  ;;  %v4303_v9 = vld [vmem:[%s5994_s0 + $0x5d8] ss:$20 sps:$4 sm:$0xff]  }
 0x21c   :  { %3262 = vst [vmem:[%s5995_s2 + $0xa0] sm:$0xff] %v2932_v22  ;;  %v4306_v22 = vld [vmem:[%s5994_s0 + $0x624] ss:$20 sps:$4 sm:$0xff]  }
 0x21d   :  { %v2517_v33 = vpop.f32.mrf.mxu1  ;;  %v2934_v57 = vpop.f32.mrf.mxu0 }
 0x21e   :  { %v2935_v56 = vadd.f32 %v2934_v57, %v2510_v23  ;;  %v2518_v26 = vadd.f32 %v2517_v33, %v5052_v7 }
 0x21f   :  { %v2519_v45 = vpop.f32.mrf.mxu1  ;;  %v3778_v19 = vpop.f32.mrf.mxu0 }
 0x220   :  { %3263 = vst [vmem:[%s5995_s2 + $0xa8] sm:$0xff] %v2935_v56  ;;  %v4304_v45 = vld [vmem:[%s5994_s0 + $0x620] ss:$20 sps:$4 sm:$0xff]  }
 0x221   :  { %v2522_v3 = vpop.f32.mrf.mxu1  ;;  %2713 = vmatmul.mubr.bf16.gmra.mxu1 %v4292_v31  ;;  %v2939_v61 = vpop.f32.mrf.mxu0  ;;  %3876 = vmatmul.mubr.msk.bf16.gmra.mxu0 %vm1819_vm1, %v4295_v24  ;;  %v4307_v19 = vld [vmem:[%s5994_s0 + $0x600] ss:$20 sps:$4 sm:$0xff]  }
 0x222   :  { %v2940_v14 = vadd.f32 %v2939_v61, %v2515_v28  ;;  %2720 = vmatprep.mubr.bf16.mxu1 %v4298_v54  ;;  %3879 = vmatprep.mubr.msk.bf16.mxu0 %vm4347_vm0, %v6047_v25  ;;  %v2523_v8 = vadd.f32 %v2522_v3, %v5065_v32  ;;  %v4310_v3 = vld [vmem:[%s5994_s0 + $0x64c] ss:$20 sps:$4 sm:$0xff]  }
 0x223   :  { %v2524_v60 = vpop.f32.mrf.mxu1  ;;  %v3781_v17 = vpop.f32.mrf.mxu0 }
 0x224   :  { %3264 = vst [vmem:[%s5995_s2 + $0xb0] sm:$0xff] %v2940_v14 }
 0x225   :  { %v2525_v1 = vpop.f32.mrf.mxu1  ;;  %v2942_v46 = vpop.f32.mrf.mxu0 }
 0x226   :  { %v2943_v15 = vadd.f32 %v2942_v46, %v2518_v26  ;;  %v2526_v0 = vadd.f32 %v2525_v1, %v5072_v52 }
 0x227   :  { %v2527_v7 = vpop.f32.mrf.mxu1  ;;  %v3782_v40 = vpop.f32.mrf.mxu0 }
 0x228   :  { %3265 = vst [vmem:[%s5995_s2 + $0xb8] sm:$0xff] %v2943_v15  ;;  %v4308_v15 = vld [vmem:[%s5994_s0 + $0x648] ss:$20 sps:$4 sm:$0xff]  }
 0x229   :  { %v2530_v5 = vpop.f32.mrf.mxu1  ;;  %2721 = vmatmul.mubr.bf16.gmra.mxu1 %v4296_v16  ;;  %v2947_v50 = vpop.f32.mrf.mxu0  ;;  %3880 = vmatmul.mubr.msk.bf16.gmra.mxu0 %vm1819_vm1, %v4299_v36  ;;  %v4314_v40 = vld [vmem:[%s5994_s0 + $0x674] ss:$20 sps:$4 sm:$0xff]  }
 0x22a   :  { %v2948_v37 = vadd.f32 %v2947_v50, %v2523_v8  ;;  %2728 = vmatprep.mubr.bf16.mxu1 %v4302_v59  ;;  %3883 = vmatprep.mubr.msk.bf16.mxu0 %vm4347_vm0, %v6047_v25  ;;  %v2531_v39 = vadd.f32 %v2530_v5, %v5085_v21  ;;  %v4311_v59 = vld [vmem:[%s5994_s0 + $0x628] ss:$20 sps:$4 sm:$0xff]  }
 0x22b   :  { %v2532_v35 = vpop.f32.mrf.mxu1  ;;  %v3785_v29 = vpop.f32.mrf.mxu0 }
 0x22c   :  { %3266 = vst [vmem:[%s5995_s2 + $0xc0] sm:$0xff] %v2948_v37 }
 0x22d   :  { %v2533_v32 = vpop.f32.mrf.mxu1  ;;  %v2950_v4 = vpop.f32.mrf.mxu0 }
 0x22e   :  { %v2951_v43 = vadd.f32 %v2950_v4, %v2526_v0  ;;  %v2534_v56 = vadd.f32 %v2533_v32, %v5092_v42 }
 0x22f   :  { %v2535_v52 = vpop.f32.mrf.mxu1  ;;  %v3786_v13 = vpop.f32.mrf.mxu0 }
 0x230   :  { %3267 = vst [vmem:[%s5995_s2 + $0xc8] sm:$0xff] %v2951_v43 }
 0x231   :  { %v2538_v23 = vpop.f32.mrf.mxu1  ;;  %2729 = vmatmul.mubr.bf16.gmra.mxu1 %v4300_v47  ;;  %v2955_v33 = vpop.f32.mrf.mxu0  ;;  %3884 = vmatmul.mubr.msk.bf16.gmra.mxu0 %vm1819_vm1, %v4303_v9  ;;  %v4312_v47 = vld [vmem:[%s5994_s0 + $0x670] ss:$20 sps:$4 sm:$0xff]  }
 0x232   :  { %v2956_v57 = vadd.f32 %v2955_v33, %v2531_v39  ;;  %2736 = vmatprep.mubr.bf16.mxu1 %v4306_v22  ;;  %3887 = vmatprep.mubr.msk.bf16.mxu0 %vm4347_vm0, %v6047_v25  ;;  %v2539_v14 = vadd.f32 %v2538_v23, %v5105_v30  ;;  %v4315_v9 = vld [vmem:[%s5994_s0 + $0x650] ss:$20 sps:$4 sm:$0xff]  }
 0x233   :  { %v2540_v31 = vpop.f32.mrf.mxu1  ;;  %v3789_v24 = vpop.f32.mrf.mxu0  ;;  %v4318_v22 = vld [vmem:[%s5994_s0 + $0x69c] ss:$20 sps:$4 sm:$0xff]  }
 0x234   :  { %3268 = vst [vmem:[%s5995_s2 + $0xd0] sm:$0xff] %v2956_v57 }
 0x235   :  { %v2541_v21 = vpop.f32.mrf.mxu1  ;;  %v2958_v54 = vpop.f32.mrf.mxu0 }
 0x236   :  { %v2959_v28 = vadd.f32 %v2958_v54, %v2534_v56  ;;  %v2542_v16 = vadd.f32 %v2541_v21, %v5112_v53  ;;  %v4316_v21 = vld [vmem:[%s5994_s0 + $0x698] ss:$20 sps:$4 sm:$0xff]  }
 0x237   :  { %v2543_v42 = vpop.f32.mrf.mxu1  ;;  %v3790_v61 = vpop.f32.mrf.mxu0  ;;  %v4319_v54 = vld [vmem:[%s5994_s0 + $0x678] ss:$20 sps:$4 sm:$0xff]  }
 0x238   :  { %3269 = vst [vmem:[%s5995_s2 + $0xd8] sm:$0xff] %v2959_v28 }
 0x239   :  { %v2546_v60 = vpop.f32.mrf.mxu1  ;;  %2737 = vmatmul.mubr.bf16.gmra.mxu1 %v4304_v45  ;;  %v2963_v17 = vpop.f32.mrf.mxu0  ;;  %3888 = vmatmul.mubr.msk.bf16.gmra.mxu0 %vm1819_vm1, %v4307_v19  ;;  %v4322_v19 = vld [vmem:[%s5994_s0 + $0x6c4] ss:$20 sps:$4 sm:$0xff]  }
 0x23a   :  { %v2964_v26 = vadd.f32 %v2963_v17, %v2539_v14  ;;  %2744 = vmatprep.mubr.bf16.mxu1 %v4310_v3  ;;  %3891 = vmatprep.mubr.msk.bf16.mxu0 %vm4347_vm0, %v6047_v25  ;;  %v2547_v5 = vadd.f32 %v2546_v60, %v5125_v49 }
 0x23b   :  { %v2548_v1 = vpop.f32.mrf.mxu1  ;;  %v3793_v46 = vpop.f32.mrf.mxu0 }
 0x23c   :  { %3270 = vst [vmem:[%s5995_s2 + $0xe0] sm:$0xff] %v2964_v26  ;;  %v4320_v46 = vld [vmem:[%s5994_s0 + $0x6c0] ss:$20 sps:$4 sm:$0xff]  }
 0x23d   :  { %v2549_v30 = vpop.f32.mrf.mxu1  ;;  %v2966_v36 = vpop.f32.mrf.mxu0 }
 0x23e   :  { %v2967_v7 = vadd.f32 %v2966_v36, %v2542_v16  ;;  %v2550_v32 = vadd.f32 %v2549_v30, %v5132_v12  ;;  %v4323_v16 = vld [vmem:[%s5994_s0 + $0x6a0] ss:$20 sps:$4 sm:$0xff]  }
 0x23f   :  { %v2551_v53 = vpop.f32.mrf.mxu1  ;;  %v3794_v8 = vpop.f32.mrf.mxu0  ;;  %v4326_v36 = vld [vmem:[%s5994_s0 + $0x6ec] ss:$20 sps:$4 sm:$0xff]  }
 0x240   :  { %3271 = vst [vmem:[%s5995_s2 + $0xe8] sm:$0xff] %v2967_v7 }
 0x241   :  { %v2554_v50 = vpop.f32.mrf.mxu1  ;;  %2745 = vmatmul.mubr.bf16.gmra.mxu1 %v4308_v15  ;;  %v2971_v37 = vpop.f32.mrf.mxu0  ;;  %3892 = vmatmul.mubr.msk.bf16.gmra.mxu0 %vm1819_vm1, %v4311_v59 }
 0x242   :  { %v2972_v35 = vadd.f32 %v2971_v37, %v2547_v5  ;;  %2752 = vmatprep.mubr.bf16.mxu1 %v4314_v40  ;;  %3895 = vmatprep.mubr.msk.bf16.mxu0 %vm4347_vm0, %v6047_v25  ;;  %v2555_v13 = vadd.f32 %v2554_v50, %v5145_v41 }
 0x243   :  { %v2556_v29 = vpop.f32.mrf.mxu1  ;;  %v3797_v0 = vpop.f32.mrf.mxu0 }
 0x244   :  { %3272 = vst [vmem:[%s5995_s2 + $0xf0] sm:$0xff] %v2972_v35  ;;  %v4324_v35 = vld [vmem:[%s5994_s0 + $0x6e8] ss:$20 sps:$4 sm:$0xff]  }
 0x245   :  { %v2557_v49 = vpop.f32.mrf.mxu1  ;;  %v2974_v4 = vpop.f32.mrf.mxu0  ;;  %v4327_v29 = vld [vmem:[%s5994_s0 + $0x6c8] ss:$20 sps:$4 sm:$0xff]  }
 0x246   :  { %v2975_v43 = vadd.f32 %v2974_v4, %v2550_v32  ;;  %v2558_v24 = vadd.f32 %v2557_v49, %v5152_v48  ;;  %v4330_v32 = vld [vmem:[%s5994_s0 + $0x714] ss:$20 sps:$4 sm:$0xff]  }
 0x247   :  { %v2559_v12 = vpop.f32.mrf.mxu1  ;;  %v3798_v52 = vpop.f32.mrf.mxu0 }
 0x248   :  { %3273 = vst [vmem:[%s5995_s2 + $0xf8] sm:$0xff] %v2975_v43 }
 0x249   :  { %v2562_v39 = vpop.f32.mrf.mxu1  ;;  %2753 = vmatmul.mubr.bf16.gmra.mxu1 %v4312_v47  ;;  %v2979_v23 = vpop.f32.mrf.mxu0  ;;  %3896 = vmatmul.mubr.msk.bf16.gmra.mxu0 %vm1819_vm1, %v4315_v9 }
 0x24a   :  { %v2980_v33 = vadd.f32 %v2979_v23, %v2555_v13  ;;  %2760 = vmatprep.mubr.bf16.mxu1 %v4318_v22  ;;  %3899 = vmatprep.mubr.msk.bf16.mxu0 %vm4347_vm0, %v6047_v25  ;;  %v2563_v3 = vadd.f32 %v2562_v39, %v5165_v2  ;;  %v4328_v39 = vld [vmem:[%s5994_s0 + $0x710] ss:$20 sps:$4 sm:$0xff]  }
 0x24b   :  { %v2564_v57 = vpop.f32.mrf.mxu1  ;;  %v3801_v31 = vpop.f32.mrf.mxu0  ;;  %v4331_v23 = vld [vmem:[%s5994_s0 + $0x6f0] ss:$20 sps:$4 sm:$0xff]  }
 0x24c   :  { %3274 = vst [vmem:[%s5995_s2 + $0x100] sm:$0xff] %v2980_v33  ;;  %v4334_v57 = vld [vmem:[%s5994_s0 + $0x73c] ss:$20 sps:$4 sm:$0xff]  }
 0x24d   :  { %v2565_v41 = vpop.f32.mrf.mxu1  ;;  %v2982_v56 = vpop.f32.mrf.mxu0 }
 0x24e   :  { %v2983_v45 = vadd.f32 %v2982_v56, %v2558_v24  ;;  %v2566_v26 = vadd.f32 %v2565_v41, %v5172_v18 }
 0x24f   :  { %v2567_v48 = vpop.f32.mrf.mxu1  ;;  %v3802_v28 = vpop.f32.mrf.mxu0 }
 0x250   :  { %3275 = vst [vmem:[%s5995_s2 + $0x108] sm:$0xff] %v2983_v45  ;;  %v4332_v28 = vld [vmem:[%s5994_s0 + $0x738] ss:$20 sps:$4 sm:$0xff]  }
 0x251   :  { %v2570_v42 = vpop.f32.mrf.mxu1  ;;  %2761 = vmatmul.mubr.bf16.gmra.mxu1 %v4316_v21  ;;  %v2987_v61 = vpop.f32.mrf.mxu0  ;;  %3900 = vmatmul.mubr.msk.bf16.gmra.mxu0 %vm1819_vm1, %v4319_v54 }
 0x252   :  { %v2988_v14 = vadd.f32 %v2987_v61, %v2563_v3  ;;  %2768 = vmatprep.mubr.bf16.mxu1 %v4322_v19  ;;  %3903 = vmatprep.mubr.msk.bf16.mxu0 %vm4347_vm0, %v6047_v25  ;;  %v2571_v59 = vadd.f32 %v2570_v42, %v5185_v34  ;;  %v4335_v3 = vld [vmem:[%s5994_s0 + $0x718] ss:$20 sps:$4 sm:$0xff]  }
 0x253   :  { %v2572_v60 = vpop.f32.mrf.mxu1  ;;  %v3805_v17 = vpop.f32.mrf.mxu0  ;;  %v4338_v61 = vld [vmem:[%s5994_s0 + $0x764] ss:$20 sps:$4 sm:$0xff]  }
 0x254   :  { %3276 = vst [vmem:[%s5995_s2 + $0x110] sm:$0xff] %v2988_v14 }
 0x255   :  { %v2573_v2 = vpop.f32.mrf.mxu1  ;;  %v2990_v1 = vpop.f32.mrf.mxu0 }
 0x256   :  { %v2991_v30 = vadd.f32 %v2990_v1, %v2566_v26  ;;  %v2574_v50 = vadd.f32 %v2573_v2, %v5192_v63 }
 0x257   :  { %v2575_v18 = vpop.f32.mrf.mxu1  ;;  %v3806_v15 = vpop.f32.mrf.mxu0 }
 0x258   :  { %3277 = vst [vmem:[%s5995_s2 + $0x118] sm:$0xff] %v2991_v30  ;;  %v4339_v18 = vld [vmem:[%s5994_s0 + $0x740] ss:$20 sps:$4 sm:$0xff]  }
 0x259   :  { %v2578_v7 = vpop.f32.mrf.mxu1  ;;  %2769 = vmatmul.mubr.bf16.gmra.mxu1 %v4320_v46  ;;  %v2995_v40 = vpop.f32.mrf.mxu0  ;;  %3904 = vmatmul.mubr.msk.bf16.gmra.mxu0 %vm1819_vm1, %v4323_v16 }
 0x25a   :  { %v2996_v53 = vadd.f32 %v2995_v40, %v2571_v59  ;;  %2776 = vmatprep.mubr.bf16.mxu1 %v4326_v36  ;;  %3907 = vmatprep.mubr.msk.bf16.mxu0 %vm4347_vm0, %v6047_v25  ;;  %v2579_v4 = vadd.f32 %v2578_v7, %v5205_v11  ;;  %v4336_v36 = vld [vmem:[%s5994_s0 + $0x760] ss:$20 sps:$4 sm:$0xff]  }
 0x25b   :  { %v2580_v8 = vpop.f32.mrf.mxu1  ;;  %v3809_v5 = vpop.f32.mrf.mxu0  ;;  %v4342_v59 = vld [vmem:[%s5994_s0 + $0x78c] ss:$20 sps:$4 sm:$0xff]  }
 0x25c   :  { %3278 = vst [vmem:[%s5995_s2 + $0x120] sm:$0xff] %v2996_v53 }
 0x25d   :  { %v2581_v34 = vpop.f32.mrf.mxu1  ;;  %v2998_v37 = vpop.f32.mrf.mxu0 }
 0x25e   :  { %v2999_v0 = vadd.f32 %v2998_v37, %v2574_v50  ;;  %v2582_v52 = vadd.f32 %v2581_v34, %v5212_v44 }
 0x25f   :  { %v2583_v63 = vpop.f32.mrf.mxu1  ;;  %v3810_v49 = vpop.f32.mrf.mxu0 }
 0x260   :  { %3279 = vst [vmem:[%s5995_s2 + $0x128] sm:$0xff] %v2999_v0  ;;  %v4343_v0 = vld [vmem:[%s5994_s0 + $0x768] ss:$20 sps:$4 sm:$0xff]  }
 0x261   :  { %v2586_v47 = vpop.f32.mrf.mxu1  ;;  %2777 = vmatmul.mubr.bf16.gmra.mxu1 %v4324_v35  ;;  %v3003_v9 = vpop.f32.mrf.mxu0  ;;  %3908 = vmatmul.mubr.msk.bf16.gmra.mxu0 %vm1819_vm1, %v4327_v29  ;;  %v4340_v29 = vld [vmem:[%s5994_s0 + $0x788] ss:$20 sps:$4 sm:$0xff]  }
 0x262   :  { %v3004_v43 = vadd.f32 %v3003_v9, %v2579_v4  ;;  %2784 = vmatprep.mubr.bf16.mxu1 %v4330_v32  ;;  %3911 = vmatprep.mubr.msk.bf16.mxu0 %vm4347_vm0, %v6047_v25  ;;  %v2587_v24 = vadd.f32 %v2586_v47, %v5225_v55 }
 0x263   :  { %v2588_v22 = vpop.f32.mrf.mxu1  ;;  %v3813_v12 = vpop.f32.mrf.mxu0 }
 0x264   :  { %3280 = vst [vmem:[%s5995_s2 + $0x130] sm:$0xff] %v3004_v43 }
 0x265   :  { %v2589_v11 = vpop.f32.mrf.mxu1  ;;  %v3006_v13 = vpop.f32.mrf.mxu0 }
 0x266   :  { %v3007_v33 = vadd.f32 %v3006_v13, %v2582_v52  ;;  %v2590_v19 = vadd.f32 %v2589_v11, %v5232_v27  ;;  %v4344_v11 = vld [vmem:[%s5994_s0 + $0x790] ss:$20 sps:$4 sm:$0xff]  }
 0x267   :  { %v2591_v44 = vpop.f32.mrf.mxu1  ;;  %v3814_v31 = vpop.f32.mrf.mxu0 }
 0x268   :  { %3281 = vst [vmem:[%s5995_s2 + $0x138] sm:$0xff] %v3007_v33 }
 0x269   :  { %v2594_v41 = vpop.f32.mrf.mxu1  ;;  %2785 = vmatmul.mubr.bf16.gmra.mxu1 %v4328_v39  ;;  %v3011_v56 = vpop.f32.mrf.mxu0  ;;  %3912 = vmatmul.mubr.msk.bf16.gmra.mxu0 %vm1819_vm1, %v4331_v23 }
 0x26a   :  { %v3012_v21 = vadd.f32 %v3011_v56, %v2587_v24  ;;  %2792 = vmatprep.mubr.bf16.mxu1 %v4334_v57  ;;  %3915 = vmatprep.mubr.msk.bf16.mxu0 %vm4347_vm0, %v6047_v25  ;;  %v2595_v60 = vadd.f32 %v2594_v41, %v5245_v38  ;;  %v6048_v24 = vld [vmem:[#allocation50_spill] sm:$0xff] }
 0x26b   :  { %v2596_v54 = vpop.f32.mrf.mxu1  ;;  %v3817_v45 = vpop.f32.mrf.mxu0 }
 0x26c   :  { %3282 = vst [vmem:[%s5995_s2 + $0x140] sm:$0xff] %v3012_v21 }
 0x26d   :  { %v2597_v55 = vpop.f32.mrf.mxu1  ;;  %v3014_v48 = vpop.f32.mrf.mxu0 }
 0x26e   :  { %v3015_v42 = vadd.f32 %v3014_v48, %v2590_v19  ;;  %v2598_v16 = vadd.f32 %v2597_v55, %v5252_v10  ;;  %v6049_v19 = vld [vmem:[#allocation2_spill] sm:$0xff] }
 0x26f   :  { %v2599_v27 = vpop.f32.mrf.mxu1  ;;  %v3818_v14 = vpop.f32.mrf.mxu0 }
 0x270   :  { %3283 = vst [vmem:[%s5995_s2 + $0x148] sm:$0xff] %v3015_v42  ;;  %v6050_v27 = vld [vmem:[#allocation3_spill] sm:$0xff] }
 0x271   :  { %v2602_v17 = vpop.f32.mrf.mxu1  ;;  %2793 = vmatmul.mubr.bf16.gmra.mxu1 %v4332_v28  ;;  %v3019_v26 = vpop.f32.mrf.mxu0  ;;  %3916 = vmatmul.mubr.msk.bf16.gmra.mxu0 %vm1819_vm1, %v4335_v3 }
 0x272   :  { %v3020_v2 = vadd.f32 %v3019_v26, %v2595_v60  ;;  %2800 = vmatprep.mubr.bf16.mxu1 %v4338_v61  ;;  %3919 = vmatprep.mubr.msk.bf16.mxu0 %vm4347_vm0, %v6047_v25  ;;  %v2603_v40 = vadd.f32 %v2602_v17, %v5265_v20 }
 0x273   :  { %v2604_v1 = vpop.f32.mrf.mxu1  ;;  %v3821_v46 = vpop.f32.mrf.mxu0 }
 0x274   :  { %3284 = vst [vmem:[%s5995_s2 + $0x150] sm:$0xff] %v3020_v2  ;;  %v6051_v46 = vld [vmem:[#allocation4_spill] sm:$0xff] }
 0x275   :  { %v2605_v38 = vpop.f32.mrf.mxu1  ;;  %v3022_v30 = vpop.f32.mrf.mxu0 }
 0x276   :  { %v3023_v15 = vadd.f32 %v3022_v30, %v2598_v16  ;;  %v2606_v37 = vadd.f32 %v2605_v38, %v5272_v62 }
 0x277   :  { %v2607_v10 = vpop.f32.mrf.mxu1  ;;  %v3822_v7 = vpop.f32.mrf.mxu0 }
 0x278   :  { %3285 = vst [vmem:[%s5995_s2 + $0x158] sm:$0xff] %v3023_v15 }
 0x279   :  { %v2610_v53 = vpop.f32.mrf.mxu1  ;;  %2801 = vmatmul.mubr.bf16.gmra.mxu1 %v4336_v36  ;;  %v3027_v8 = vpop.f32.mrf.mxu0  ;;  %3920 = vmatmul.mubr.msk.bf16.gmra.mxu0 %vm1819_vm1, %v4339_v18 }
 0x27a   :  { %v3028_v5 = vadd.f32 %v3027_v8, %v2603_v40  ;;  %2808 = vmatprep.mubr.bf16.mxu1 %v4342_v59  ;;  %3923 = vmatprep.mubr.msk.bf16.mxu0 %vm4347_vm0, %v6047_v25  ;;  %v2611_v4 = vadd.f32 %v2610_v53, %v5285_v6  ;;  %v6052_v59 = vld [vmem:[#allocation5_spill] sm:$0xff] }
 0x27b   :  { %v2612_v50 = vpop.f32.mrf.mxu1  ;;  %v3825_v34 = vpop.f32.mrf.mxu0 }
 0x27c   :  { %3286 = vst [vmem:[%s5995_s2 + $0x160] sm:$0xff] %v3028_v5  ;;  %v6053_v50 = vld [vmem:[#allocation6_spill] sm:$0xff] }
 0x27d   :  { %v2613_v20 = vpop.f32.mrf.mxu1  ;;  %v3030_v35 = vpop.f32.mrf.mxu0 }
 0x27e   :  { %v3031_v32 = vadd.f32 %v3030_v35, %v2606_v37  ;;  %v2614_v12 = vadd.f32 %v2613_v20, %v5292_v51 }
 0x27f   :  { %v2615_v63 = vpop.f32.mrf.mxu1  ;;  %v3826_v49 = vpop.f32.mrf.mxu0 }
 0x280   :  { %3287 = vst [vmem:[%s5995_s2 + $0x168] sm:$0xff] %v3031_v32  ;;  %v6054_v32 = vld [vmem:[#allocation7_spill] sm:$0xff] }
 0x281   :  { %v2618_v62 = vpop.f32.mrf.mxu1  ;;  %2809 = vmatmul.mubr.bf16.gmra.mxu1 %v4340_v29  ;;  %v3035_v47 = vpop.f32.mrf.mxu0  ;;  %3924 = vmatmul.mubr.msk.bf16.gmra.mxu0 %vm1819_vm1, %v4343_v0 }
 0x282   :  { %v3036_v9 = vadd.f32 %v3035_v47, %v2611_v4  ;;  %3927 = vmatprep.mubr.msk.bf16.mxu0 %vm4347_vm0, %v6047_v25  ;;  %v2619_v33 = vadd.f32 %v2618_v62, %v5305_v58 }
 0x283   :  { %v2620_v43 = vpop.f32.mrf.mxu1  ;;  %v3829_v22 = vpop.f32.mrf.mxu0 }
 0x284   :  { %3288 = vst [vmem:[%s5995_s2 + $0x170] sm:$0xff] %v3036_v9  ;;  %v6055_v43 = vld [vmem:[#allocation8_spill] sm:$0xff] }
 0x285   :  { %v2621_v6 = vpop.f32.mrf.mxu1  ;;  %v3038_v52 = vpop.f32.mrf.mxu0 }
 0x286   :  { %v3039_v13 = vadd.f32 %v3038_v52, %v2614_v12  ;;  %v2622_v41 = vadd.f32 %v2621_v6, %v6048_v24 }
 0x287   :  { %v2623_v39 = vpop.f32.mrf.mxu1  ;;  %v3830_v23 = vpop.f32.mrf.mxu0 }
 0x288   :  { %3289 = vst [vmem:[%s5995_s2 + $0x178] sm:$0xff] %v3039_v13  ;;  %v6056_v39 = vld [vmem:[#allocation9_spill] sm:$0xff] }
 0x289   :  { %v2626_v25 = vpop.f32.mrf.mxu1  ;;  %v3043_v51 = vpop.f32.mrf.mxu0  ;;  %3928 = vmatmul.mubr.msk.bf16.gmra.mxu0 %vm1819_vm1, %v4344_v11 }
 0x28a   :  { %v3044_v57 = vadd.f32 %v3043_v51, %v2619_v33  ;;  %v2627_v55 = vadd.f32 %v2626_v25, %v6049_v19 }
 0x28b   :  { %v2628_v44 = vpop.f32.mrf.mxu1  ;;  %v3833_v31 = vpop.f32.mrf.mxu0 }
 0x28c   :  { %3290 = vst [vmem:[%s5995_s2 + $0x180] sm:$0xff] %v3044_v57  ;;  %v6057_v31 = vld [vmem:[#allocation10_spill] sm:$0xff] }
 0x28d   :  { %v2629_v56 = vpop.f32.mrf.mxu1  ;;  %v3046_v21 = vpop.f32.mrf.mxu0 }
 0x28e   :  { %v3047_v58 = vadd.f32 %v3046_v21, %v2622_v41  ;;  %v2630_v14 = vadd.f32 %v2629_v56, %v6050_v27 }
 0x28f   :  { %v2631_v54 = vpop.f32.mrf.mxu1  ;;  %v3834_v45 = vpop.f32.mrf.mxu0 }
 0x290   :  { %3291 = vst [vmem:[%s5995_s2 + $0x188] sm:$0xff] %v3047_v58  ;;  %v6058_v45 = vld [vmem:[#allocation11_spill] sm:$0xff] }
 0x291   :  { %v2634_v48 = vpop.f32.mrf.mxu1  ;;  %v3051_v28 = vpop.f32.mrf.mxu0 }
 0x292   :  { %v3052_v3 = vadd.f32 %v3051_v28, %v2627_v55  ;;  %v2635_v16 = vadd.f32 %v2634_v48, %v6051_v46 }
 0x293   :  { %v2636_v42 = vpop.f32.mrf.mxu1  ;;  %v3837_v61 = vpop.f32.mrf.mxu0 }
 0x294   :  { %3292 = vst [vmem:[%s5995_s2 + $0x190] sm:$0xff] %v3052_v3  ;;  %v6059_v61 = vld [vmem:[#allocation12_spill] sm:$0xff] }
 0x295   :  { %v2637_v60 = vpop.f32.mrf.mxu1  ;;  %v3054_v17 = vpop.f32.mrf.mxu0 }
 0x296   :  { %v3055_v26 = vadd.f32 %v3054_v17, %v2630_v14  ;;  %v2638_v10 = vadd.f32 %v2637_v60, %v6052_v59 }
 0x297   :  { %v2639_v2 = vpop.f32.mrf.mxu1  ;;  %v3838_v1 = vpop.f32.mrf.mxu0 }
 0x298   :  { %3293 = vst [vmem:[%s5995_s2 + $0x198] sm:$0xff] %v3055_v26  ;;  %v6060_v1 = vld [vmem:[#allocation13_spill] sm:$0xff] }
 0x299   :  { %v2642_v38 = vpop.f32.mrf.mxu1  ;;  %v3059_v30 = vpop.f32.mrf.mxu0 }
 0x29a   :  { %v3060_v36 = vadd.f32 %v3059_v30, %v2635_v16  ;;  %v2643_v34 = vadd.f32 %v2642_v38, %v6053_v50 }
 0x29b   :  { %v2644_v18 = vpop.f32.mrf.mxu1  ;;  %v3841_v15 = vpop.f32.mrf.mxu0 }
 0x29c   :  { %3294 = vst [vmem:[%s5995_s2 + $0x1a0] sm:$0xff] %v3060_v36  ;;  %v6061_v15 = vld [vmem:[#allocation14_spill] sm:$0xff] }
 0x29d   :  { %v2645_v7 = vpop.f32.mrf.mxu1  ;;  %v3062_v40 = vpop.f32.mrf.mxu0 }
 0x29e   :  { %v3063_v53 = vadd.f32 %v3062_v40, %v2638_v10  ;;  %v2646_v63 = vadd.f32 %v2645_v7, %v6054_v32 }
 0x29f   :  { %v2647_v8 = vpop.f32.mrf.mxu1  ;;  %v3842_v5 = vpop.f32.mrf.mxu0 }
 0x2a0   :  { %3295 = vst [vmem:[%s5995_s2 + $0x1a8] sm:$0xff] %v3063_v53  ;;  %v6062_v5 = vld [vmem:[#allocation15_spill] sm:$0xff] }
 0x2a1   :  { %v2650_v37 = vpop.f32.mrf.mxu1  ;;  %v3067_v20 = vpop.f32.mrf.mxu0 }
 0x2a2   :  { %v3068_v35 = vadd.f32 %v3067_v20, %v2643_v34  ;;  %v2651_v22 = vadd.f32 %v2650_v37, %v6055_v43 }
 0x2a3   :  { %v2652_v29 = vpop.f32.mrf.mxu1  ;;  %v3845_v0 = vpop.f32.mrf.mxu0 }
 0x2a4   :  { %3296 = vst [vmem:[%s5995_s2 + $0x1b0] sm:$0xff] %v3068_v35  ;;  %v6063_v0 = vld [vmem:[#allocation16_spill] sm:$0xff] }
 0x2a5   :  { %v2653_v49 = vpop.f32.mrf.mxu1  ;;  %v3070_v4 = vpop.f32.mrf.mxu0 }
 0x2a6   :  { %v3071_v62 = vadd.f32 %v3070_v4, %v2646_v63  ;;  %v2654_v23 = vadd.f32 %v2653_v49, %v6056_v39 }
 0x2a7   :  { %v2655_v47 = vpop.f32.mrf.mxu1  ;;  %v3846_v9 = vpop.f32.mrf.mxu0 }
 0x2a8   :  { %3297 = vst [vmem:[%s5995_s2 + $0x1b8] sm:$0xff] %v3071_v62  ;;  %v6064_v9 = vld [vmem:[#allocation17_spill] sm:$0xff] }
 0x2a9   :  { %v2658_v12 = vpop.f32.mrf.mxu1  ;;  %v3075_v6 = vpop.f32.mrf.mxu0 }
 0x2aa   :  { %v3076_v52 = vadd.f32 %v3075_v6, %v2651_v22  ;;  %v2659_v24 = vadd.f32 %v2658_v12, %v6057_v31 }
 0x2ab   :  { %v2660_v11 = vpop.f32.mrf.mxu1  ;;  %v3849_v13 = vpop.f32.mrf.mxu0 }
 0x2ac   :  { %3298 = vst [vmem:[%s5995_s2 + $0x1c0] sm:$0xff] %v3076_v52  ;;  %v6065_v13 = vld [vmem:[#allocation18_spill] sm:$0xff] }
 0x2ad   :  { %v2661_v33 = vpop.f32.mrf.mxu1  ;;  %v3078_v25 = vpop.f32.mrf.mxu0 }
 0x2ae   :  { %v3079_v51 = vadd.f32 %v3078_v25, %v2654_v23  ;;  %v2662_v19 = vadd.f32 %v2661_v33, %v6058_v45 }
 0x2af   :  { %v2663_v57 = vpop.f32.mrf.mxu1  ;;  %v3850_v44 = vpop.f32.mrf.mxu0 }
 0x2b0   :  { %3299 = vst [vmem:[%s5995_s2 + $0x1c8] sm:$0xff] %v3079_v51  ;;  %v6066_v44 = vld [vmem:[#allocation19_spill] sm:$0xff] }
 0x2b1   :  { %v2666_v41 = vpop.f32.mrf.mxu1  ;;  %v3083_v56 = vpop.f32.mrf.mxu0 }
 0x2b2   :  { %v3084_v21 = vadd.f32 %v3083_v56, %v2659_v24  ;;  %v2667_v27 = vadd.f32 %v2666_v41, %v6059_v61 }
 0x2b3   :  { %v2668_v58 = vpop.f32.mrf.mxu1  ;;  %v3853_v54 = vpop.f32.mrf.mxu0 }
 0x2b4   :  { %3300 = vst [vmem:[%s5995_s2 + $0x1d0] sm:$0xff] %v3084_v21  ;;  %v6067_v54 = vld [vmem:[#allocation20_spill] sm:$0xff] }
 0x2b5   :  { %v2669_v55 = vpop.f32.mrf.mxu1  ;;  %v3086_v48 = vpop.f32.mrf.mxu0 }
 0x2b6   :  { %v3087_v28 = vadd.f32 %v3086_v48, %v2662_v19  ;;  %v2670_v46 = vadd.f32 %v2669_v55, %v6060_v1 }
 0x2b7   :  { %v2671_v3 = vpop.f32.mrf.mxu1  ;;  %v3854_v42 = vpop.f32.mrf.mxu0 }
 0x2b8   :  { %3301 = vst [vmem:[%s5995_s2 + $0x1d8] sm:$0xff] %v3087_v28  ;;  %v6068_v42 = vld [vmem:[#allocation21_spill] sm:$0xff] }
 0x2b9   :  { %v2674_v14 = vpop.f32.mrf.mxu1  ;;  %v3091_v60 = vpop.f32.mrf.mxu0 }
 0x2ba   :  { %v3092_v17 = vadd.f32 %v3091_v60, %v2667_v27  ;;  %v2675_v59 = vadd.f32 %v2674_v14, %v6061_v15 }
 0x2bb   :  { %v2676_v26 = vpop.f32.mrf.mxu1  ;;  %v3857_v2 = vpop.f32.mrf.mxu0 }
 0x2bc   :  { %3302 = vst [vmem:[%s5995_s2 + $0x1e0] sm:$0xff] %v3092_v17  ;;  %v6069_v2 = vld [vmem:[#allocation22_spill] sm:$0xff] }
 0x2bd   :  { %v2677_v16 = vpop.f32.mrf.mxu1  ;;  %v3094_v38 = vpop.f32.mrf.mxu0 }
 0x2be   :  { %v3095_v30 = vadd.f32 %v3094_v38, %v2670_v46  ;;  %v2678_v50 = vadd.f32 %v2677_v16, %v6062_v5 }
 0x2bf   :  { %v2679_v36 = vpop.f32.mrf.mxu1  ;;  %v3858_v18 = vpop.f32.mrf.mxu0 }
 0x2c0   :  { %3303 = vst [vmem:[%s5995_s2 + $0x1e8] sm:$0xff] %v3095_v30  ;;  %v6070_v18 = vld [vmem:[#allocation23_spill] sm:$0xff] }
 0x2c1   :  { %v2682_v10 = vpop.f32.mrf.mxu1  ;;  %v3099_v7 = vpop.f32.mrf.mxu0 }
 0x2c2   :  { %v3100_v40 = vadd.f32 %v3099_v7, %v2675_v59  ;;  %v2683_v32 = vadd.f32 %v2682_v10, %v6063_v0 }
 0x2c3   :  { %v2684_v53 = vpop.f32.mrf.mxu1  ;;  %v3861_v8 = vpop.f32.mrf.mxu0 }
 0x2c4   :  { %3304 = vst [vmem:[%s5995_s2 + $0x1f0] sm:$0xff] %v3100_v40  ;;  %v6071_v8 = vld [vmem:[#allocation24_spill] sm:$0xff] }
 0x2c5   :  { %v2685_v34 = vpop.f32.mrf.mxu1  ;;  %v3102_v37 = vpop.f32.mrf.mxu0 }
 0x2c6   :  { %v3103_v20 = vadd.f32 %v3102_v37, %v2678_v50  ;;  %v2686_v43 = vadd.f32 %v2685_v34, %v6064_v9 }
 0x2c7   :  { %v2687_v35 = vpop.f32.mrf.mxu1  ;;  %v3862_v29 = vpop.f32.mrf.mxu0 }
 0x2c8   :  { %3305 = vst [vmem:[%s5995_s2 + $0x1f8] sm:$0xff] %v3103_v20  ;;  %v6072_v29 = vld [vmem:[#allocation25_spill] sm:$0xff] }
 0x2c9   :  { %v2690_v63 = vpop.f32.mrf.mxu1  ;;  %v3107_v49 = vpop.f32.mrf.mxu0 }
 0x2ca   :  { %v3108_v4 = vadd.f32 %v3107_v49, %v2683_v32  ;;  %v2691_v39 = vadd.f32 %v2690_v63, %v6065_v13 }
 0x2cb   :  { %v2692_v62 = vpop.f32.mrf.mxu1  ;;  %v3865_v47 = vpop.f32.mrf.mxu0 }
 0x2cc   :  { %3306 = vst [vmem:[%s5995_s2 + $0x200] sm:$0xff] %v3108_v4  ;;  %v6073_v47 = vld [vmem:[#allocation26_spill] sm:$0xff] }
 0x2cd   :  { %v2693_v22 = vpop.f32.mrf.mxu1  ;;  %v3110_v12 = vpop.f32.mrf.mxu0 }
 0x2ce   :  { %v3111_v6 = vadd.f32 %v3110_v12, %v2686_v43  ;;  %v2694_v31 = vadd.f32 %v2693_v22, %v6066_v44 }
 0x2cf   :  { %v2695_v52 = vpop.f32.mrf.mxu1  ;;  %v3866_v11 = vpop.f32.mrf.mxu0 }
 0x2d0   :  { %3307 = vst [vmem:[%s5995_s2 + $0x208] sm:$0xff] %v3111_v6  ;;  %v6074_v11 = vld [vmem:[#allocation27_spill] sm:$0xff] }
 0x2d1   :  { %v2698_v23 = vpop.f32.mrf.mxu1  ;;  %v3115_v33 = vpop.f32.mrf.mxu0 }
 0x2d2   :  { %v3116_v25 = vadd.f32 %v3115_v33, %v2691_v39  ;;  %v2699_v45 = vadd.f32 %v2698_v23, %v6067_v54 }
 0x2d3   :  { %v2700_v51 = vpop.f32.mrf.mxu1  ;;  %v3869_v57 = vpop.f32.mrf.mxu0 }
 0x2d4   :  { %3308 = vst [vmem:[%s5995_s2 + $0x210] sm:$0xff] %v3116_v25  ;;  %v6075_v57 = vld [vmem:[#allocation28_spill] sm:$0xff] }
 0x2d5   :  { %v2701_v24 = vpop.f32.mrf.mxu1  ;;  %v3118_v41 = vpop.f32.mrf.mxu0 }
 0x2d6   :  { %v3119_v56 = vadd.f32 %v3118_v41, %v2694_v31  ;;  %v2702_v61 = vadd.f32 %v2701_v24, %v6068_v42 }
 0x2d7   :  { %v2703_v21 = vpop.f32.mrf.mxu1  ;;  %v3870_v58 = vpop.f32.mrf.mxu0 }
 0x2d8   :  { %3309 = vst [vmem:[%s5995_s2 + $0x218] sm:$0xff] %v3119_v56  ;;  %v6076_v58 = vld [vmem:[#allocation29_spill] sm:$0xff] }
 0x2d9   :  { %v2706_v19 = vpop.f32.mrf.mxu1  ;;  %v3123_v55 = vpop.f32.mrf.mxu0 }
 0x2da   :  { %v3124_v48 = vadd.f32 %v3123_v55, %v2699_v45  ;;  %v2707_v1 = vadd.f32 %v2706_v19, %v6069_v2 }
 0x2db   :  { %v2708_v28 = vpop.f32.mrf.mxu1  ;;  %v3873_v3 = vpop.f32.mrf.mxu0 }
 0x2dc   :  { %3310 = vst [vmem:[%s5995_s2 + $0x220] sm:$0xff] %v3124_v48  ;;  %v6077_v3 = vld [vmem:[#allocation30_spill] sm:$0xff] }
 0x2dd   :  { %v2709_v27 = vpop.f32.mrf.mxu1  ;;  %v3126_v14 = vpop.f32.mrf.mxu0 }
 0x2de   :  { %v3127_v60 = vadd.f32 %v3126_v14, %v2702_v61  ;;  %v2710_v15 = vadd.f32 %v2709_v27, %v6070_v18 }
 0x2df   :  { %v2711_v17 = vpop.f32.mrf.mxu1  ;;  %v3874_v26 = vpop.f32.mrf.mxu0 }
 0x2e0   :  { %3311 = vst [vmem:[%s5995_s2 + $0x228] sm:$0xff] %v3127_v60  ;;  %v6078_v26 = vld [vmem:[#allocation31_spill] sm:$0xff] }
 0x2e1   :  { %v2714_v46 = vpop.f32.mrf.mxu1  ;;  %v3131_v16 = vpop.f32.mrf.mxu0 }
 0x2e2   :  { %v3132_v38 = vadd.f32 %v3131_v16, %v2707_v1  ;;  %v2715_v5 = vadd.f32 %v2714_v46, %v6071_v8 }
 0x2e3   :  { %v2716_v30 = vpop.f32.mrf.mxu1  ;;  %v3877_v36 = vpop.f32.mrf.mxu0 }
 0x2e4   :  { %3312 = vst [vmem:[%s5995_s2 + $0x230] sm:$0xff] %v3132_v38  ;;  %v6079_v36 = vld [vmem:[#allocation32_spill] sm:$0xff] }
 0x2e5   :  { %v2717_v59 = vpop.f32.mrf.mxu1  ;;  %v3134_v10 = vpop.f32.mrf.mxu0 }
 0x2e6   :  { %v3135_v7 = vadd.f32 %v3134_v10, %v2710_v15  ;;  %v2718_v0 = vadd.f32 %v2717_v59, %v6072_v29 }
 0x2e7   :  { %v2719_v40 = vpop.f32.mrf.mxu1  ;;  %v3878_v53 = vpop.f32.mrf.mxu0 }
 0x2e8   :  { %3313 = vst [vmem:[%s5995_s2 + $0x238] sm:$0xff] %v3135_v7  ;;  %v6080_v53 = vld [vmem:[#allocation33_spill] sm:$0xff] }
 0x2e9   :  { %v2722_v50 = vpop.f32.mrf.mxu1  ;;  %v3139_v34 = vpop.f32.mrf.mxu0 }
 0x2ea   :  { %v3140_v37 = vadd.f32 %v3139_v34, %v2715_v5  ;;  %v2723_v9 = vadd.f32 %v2722_v50, %v6073_v47 }
 0x2eb   :  { %v2724_v20 = vpop.f32.mrf.mxu1  ;;  %v3881_v35 = vpop.f32.mrf.mxu0 }
 0x2ec   :  { %3314 = vst [vmem:[%s5995_s2 + $0x240] sm:$0xff] %v3140_v37  ;;  %v6081_v35 = vld [vmem:[#allocation34_spill] sm:$0xff] }
 0x2ed   :  { %v2725_v32 = vpop.f32.mrf.mxu1  ;;  %v3142_v63 = vpop.f32.mrf.mxu0 }
 0x2ee   :  { %v3143_v49 = vadd.f32 %v3142_v63, %v2718_v0  ;;  %v2726_v13 = vadd.f32 %v2725_v32, %v6074_v11 }
 0x2ef   :  { %v2727_v4 = vpop.f32.mrf.mxu1  ;;  %v3882_v62 = vpop.f32.mrf.mxu0 }
 0x2f0   :  { %3315 = vst [vmem:[%s5995_s2 + $0x248] sm:$0xff] %v3143_v49  ;;  %v6082_v62 = vld [vmem:[#allocation35_spill] sm:$0xff] }
 0x2f1   :  { %v2730_v43 = vpop.f32.mrf.mxu1  ;;  %v3147_v22 = vpop.f32.mrf.mxu0 }
 0x2f2   :  { %v3148_v12 = vadd.f32 %v3147_v22, %v2723_v9  ;;  %v2731_v44 = vadd.f32 %v2730_v43, %v6075_v57 }
 0x2f3   :  { %v2732_v6 = vpop.f32.mrf.mxu1  ;;  %v3885_v52 = vpop.f32.mrf.mxu0 }
 0x2f4   :  { %3316 = vst [vmem:[%s5995_s2 + $0x250] sm:$0xff] %v3148_v12  ;;  %v6083_v52 = vld [vmem:[#allocation36_spill] sm:$0xff] }
 0x2f5   :  { %v2733_v39 = vpop.f32.mrf.mxu1  ;;  %v3150_v23 = vpop.f32.mrf.mxu0 }
 0x2f6   :  { %v3151_v33 = vadd.f32 %v3150_v23, %v2726_v13  ;;  %v2734_v54 = vadd.f32 %v2733_v39, %v6076_v58 }
 0x2f7   :  { %v2735_v25 = vpop.f32.mrf.mxu1  ;;  %v3886_v51 = vpop.f32.mrf.mxu0 }
 0x2f8   :  { %3317 = vst [vmem:[%s5995_s2 + $0x258] sm:$0xff] %v3151_v33  ;;  %v6084_v51 = vld [vmem:[#allocation37_spill] sm:$0xff] }
 0x2f9   :  { %v2738_v31 = vpop.f32.mrf.mxu1  ;;  %v3155_v24 = vpop.f32.mrf.mxu0 }
 0x2fa   :  { %v3156_v41 = vadd.f32 %v3155_v24, %v2731_v44  ;;  %v2739_v42 = vadd.f32 %v2738_v31, %v6077_v3 }
 0x2fb   :  { %v2740_v56 = vpop.f32.mrf.mxu1  ;;  %v3889_v21 = vpop.f32.mrf.mxu0 }
 0x2fc   :  { %3318 = vst [vmem:[%s5995_s2 + $0x260] sm:$0xff] %v3156_v41  ;;  %v6085_v21 = vld [vmem:[#allocation38_spill] sm:$0xff] }
 0x2fd   :  { %v2741_v45 = vpop.f32.mrf.mxu1  ;;  %v3158_v19 = vpop.f32.mrf.mxu0 }
 0x2fe   :  { %v3159_v55 = vadd.f32 %v3158_v19, %v2734_v54  ;;  %v2742_v2 = vadd.f32 %v2741_v45, %v6078_v26 }
 0x2ff   :  { %v2743_v48 = vpop.f32.mrf.mxu1  ;;  %v3890_v28 = vpop.f32.mrf.mxu0 }
 0x300   :  { %3319 = vst [vmem:[%s5995_s2 + $0x268] sm:$0xff] %v3159_v55  ;;  %v6086_v28 = vld [vmem:[#allocation39_spill] sm:$0xff] }
 0x301   :  { %v2746_v61 = vpop.f32.mrf.mxu1  ;;  %v3163_v27 = vpop.f32.mrf.mxu0 }
 0x302   :  { %v3164_v14 = vadd.f32 %v3163_v27, %v2739_v42  ;;  %v2747_v18 = vadd.f32 %v2746_v61, %v6079_v36 }
 0x303   :  { %v2748_v60 = vpop.f32.mrf.mxu1  ;;  %v3893_v17 = vpop.f32.mrf.mxu0 }
 0x304   :  { %3320 = vst [vmem:[%s5995_s2 + $0x270] sm:$0xff] %v3164_v14  ;;  %v6087_v17 = vld [vmem:[#allocation40_spill] sm:$0xff] }
 0x305   :  { %v2749_v1 = vpop.f32.mrf.mxu1  ;;  %v3166_v46 = vpop.f32.mrf.mxu0 }
 0x306   :  { %v3167_v16 = vadd.f32 %v3166_v46, %v2742_v2  ;;  %v2750_v8 = vadd.f32 %v2749_v1, %v6080_v53 }
 0x307   :  { %v2751_v38 = vpop.f32.mrf.mxu1  ;;  %v3894_v30 = vpop.f32.mrf.mxu0 }
 0x308   :  { %3321 = vst [vmem:[%s5995_s2 + $0x278] sm:$0xff] %v3167_v16  ;;  %v6088_v30 = vld [vmem:[#allocation41_spill] sm:$0xff] }
 0x309   :  { %v2754_v15 = vpop.f32.mrf.mxu1  ;;  %v3171_v59 = vpop.f32.mrf.mxu0 }
 0x30a   :  { %v3172_v10 = vadd.f32 %v3171_v59, %v2747_v18  ;;  %v2755_v29 = vadd.f32 %v2754_v15, %v6081_v35 }
 0x30b   :  { %v2756_v7 = vpop.f32.mrf.mxu1  ;;  %v3897_v40 = vpop.f32.mrf.mxu0 }
 0x30c   :  { %3322 = vst [vmem:[%s5995_s2 + $0x280] sm:$0xff] %v3172_v10  ;;  %v6089_v40 = vld [vmem:[#allocation42_spill] sm:$0xff] }
 0x30d   :  { %v2757_v5 = vpop.f32.mrf.mxu1  ;;  %v3174_v50 = vpop.f32.mrf.mxu0 }
 0x30e   :  { %v3175_v34 = vadd.f32 %v3174_v50, %v2750_v8  ;;  %v2758_v47 = vadd.f32 %v2757_v5, %v6082_v62 }
 0x30f   :  { %v2759_v37 = vpop.f32.mrf.mxu1  ;;  %v3898_v20 = vpop.f32.mrf.mxu0 }
 0x310   :  { %3323 = vst [vmem:[%s5995_s2 + $0x288] sm:$0xff] %v3175_v34  ;;  %v6090_v20 = vld [vmem:[#allocation43_spill] sm:$0xff] }
 0x311   :  { %v2762_v0 = vpop.f32.mrf.mxu1  ;;  %v3179_v32 = vpop.f32.mrf.mxu0 }
 0x312   :  { %v3180_v63 = vadd.f32 %v3179_v32, %v2755_v29  ;;  %v2763_v11 = vadd.f32 %v2762_v0, %v6083_v52 }
 0x313   :  { %v2764_v49 = vpop.f32.mrf.mxu1  ;;  %v3901_v4 = vpop.f32.mrf.mxu0 }
 0x314   :  { %3324 = vst [vmem:[%s5995_s2 + $0x290] sm:$0xff] %v3180_v63  ;;  %v6091_v4 = vld [vmem:[#allocation44_spill] sm:$0xff] }
 0x315   :  { %v2765_v9 = vpop.f32.mrf.mxu1  ;;  %v3182_v43 = vpop.f32.mrf.mxu0 }
 0x316   :  { %v3183_v22 = vadd.f32 %v3182_v43, %v2758_v47  ;;  %v2766_v57 = vadd.f32 %v2765_v9, %v6084_v51 }
 0x317   :  { %v2767_v12 = vpop.f32.mrf.mxu1  ;;  %v3902_v6 = vpop.f32.mrf.mxu0 }
 0x318   :  { %3325 = vst [vmem:[%s5995_s2 + $0x298] sm:$0xff] %v3183_v22  ;;  %v6092_v6 = vld [vmem:[#allocation45_spill] sm:$0xff] }
 0x319   :  { %v2770_v13 = vpop.f32.mrf.mxu1  ;;  %v3187_v39 = vpop.f32.mrf.mxu0 }
 0x31a   :  { %v3188_v23 = vadd.f32 %v3187_v39, %v2763_v11  ;;  %v2771_v58 = vadd.f32 %v2770_v13, %v6085_v21 }
 0x31b   :  { %v2772_v33 = vpop.f32.mrf.mxu1  ;;  %v3905_v25 = vpop.f32.mrf.mxu0 }
 0x31c   :  { %3326 = vst [vmem:[%s5995_s2 + $0x2a0] sm:$0xff] %v3188_v23  ;;  %v6093_v25 = vld [vmem:[#allocation46_spill] sm:$0xff] }
 0x31d   :  { %v2773_v44 = vpop.f32.mrf.mxu1  ;;  %v3190_v31 = vpop.f32.mrf.mxu0 }
 0x31e   :  { %v3191_v24 = vadd.f32 %v3190_v31, %v2766_v57  ;;  %v2774_v3 = vadd.f32 %v2773_v44, %v6086_v28 }
 0x31f   :  { %v2775_v41 = vpop.f32.mrf.mxu1  ;;  %v3906_v56 = vpop.f32.mrf.mxu0 }
 0x320   :  { %3327 = vst [vmem:[%s5995_s2 + $0x2a8] sm:$0xff] %v3191_v24  ;;  %v6094_v56 = vld [vmem:[#allocation47_spill] sm:$0xff] }
 0x321   :  { %v2778_v54 = vpop.f32.mrf.mxu1  ;;  %v3195_v45 = vpop.f32.mrf.mxu0 }
 0x322   :  { %v3196_v19 = vadd.f32 %v3195_v45, %v2771_v58  ;;  %v2779_v26 = vadd.f32 %v2778_v54, %v6087_v17 }
 0x323   :  { %v2780_v55 = vpop.f32.mrf.mxu1  ;;  %v3909_v48 = vpop.f32.mrf.mxu0 }
 0x324   :  { %3328 = vst [vmem:[%s5995_s2 + $0x2b0] sm:$0xff] %v3196_v19  ;;  %v6095_v48 = vld [vmem:[#allocation48_spill] sm:$0xff] }
 0x325   :  { %v2781_v42 = vpop.f32.mrf.mxu1  ;;  %v3198_v61 = vpop.f32.mrf.mxu0 }
 0x326   :  { %v3199_v27 = vadd.f32 %v3198_v61, %v2774_v3  ;;  %v2782_v36 = vadd.f32 %v2781_v42, %v6088_v30 }
 0x327   :  { %v2783_v14 = vpop.f32.mrf.mxu1  ;;  %v3910_v60 = vpop.f32.mrf.mxu0 }
 0x328   :  { %3329 = vst [vmem:[%s5995_s2 + $0x2b8] sm:$0xff] %v3199_v27  ;;  %v6096_v27 = vld [vmem:[#allocation49_spill] sm:$0xff] }
 0x329   :  { %v2786_v2 = vpop.f32.mrf.mxu1  ;;  %v3203_v1 = vpop.f32.mrf.mxu0 }
 0x32a   :  { %v3204_v46 = vadd.f32 %v3203_v1, %v2779_v26  ;;  %v2787_v53 = vadd.f32 %v2786_v2, %v6089_v40 }
 0x32b   :  { %v2788_v16 = vpop.f32.mrf.mxu1  ;;  %v3913_v38 = vpop.f32.mrf.mxu0 }
 0x32c   :  { %3330 = vst [vmem:[%s5995_s2 + $0x2c0] sm:$0xff] %v3204_v46 }
 0x32d   :  { %v2789_v18 = vpop.f32.mrf.mxu1  ;;  %v3206_v15 = vpop.f32.mrf.mxu0 }
 0x32e   :  { %v3207_v59 = vadd.f32 %v3206_v15, %v2782_v36  ;;  %v2790_v35 = vadd.f32 %v2789_v18, %v6090_v20 }
 0x32f   :  { %v2791_v10 = vpop.f32.mrf.mxu1  ;;  %v3914_v7 = vpop.f32.mrf.mxu0 }
 0x330   :  { %3331 = vst [vmem:[%s5995_s2 + $0x2c8] sm:$0xff] %v3207_v59 }
 0x331   :  { %v2794_v8 = vpop.f32.mrf.mxu1  ;;  %v3211_v5 = vpop.f32.mrf.mxu0 }
 0x332   :  { %v3212_v50 = vadd.f32 %v3211_v5, %v2787_v53  ;;  %v2795_v62 = vadd.f32 %v2794_v8, %v6091_v4 }
 0x333   :  { %v2796_v34 = vpop.f32.mrf.mxu1  ;;  %v3917_v37 = vpop.f32.mrf.mxu0 }
 0x334   :  { %3332 = vst [vmem:[%s5995_s2 + $0x2d0] sm:$0xff] %v3212_v50 }
 0x335   :  { %v2797_v29 = vpop.f32.mrf.mxu1  ;;  %v3214_v0 = vpop.f32.mrf.mxu0 }
 0x336   :  { %v3215_v32 = vadd.f32 %v3214_v0, %v2790_v35  ;;  %v2798_v52 = vadd.f32 %v2797_v29, %v6092_v6 }
 0x337   :  { %v2799_v63 = vpop.f32.mrf.mxu1  ;;  %v3918_v49 = vpop.f32.mrf.mxu0 }
 0x338   :  { %3333 = vst [vmem:[%s5995_s2 + $0x2d8] sm:$0xff] %v3215_v32 }
 0x339   :  { %v2802_v47 = vpop.f32.mrf.mxu1  ;;  %v3219_v9 = vpop.f32.mrf.mxu0 }
 0x33a   :  { %v3220_v43 = vadd.f32 %v3219_v9, %v2795_v62  ;;  %v2803_v51 = vadd.f32 %v2802_v47, %v6093_v25 }
 0x33b   :  { %v2804_v22 = vpop.f32.mrf.mxu1  ;;  %v3921_v12 = vpop.f32.mrf.mxu0 }
 0x33c   :  { %3334 = vst [vmem:[%s5995_s2 + $0x2e0] sm:$0xff] %v3220_v43 }
 0x33d   :  { %v2805_v11 = vpop.f32.mrf.mxu1  ;;  %v3222_v13 = vpop.f32.mrf.mxu0 }
 0x33e   :  { %v3223_v39 = vadd.f32 %v3222_v13, %v2798_v52  ;;  %v2806_v21 = vadd.f32 %v2805_v11, %v6094_v56 }
 0x33f   :  { %v2807_v23 = vpop.f32.mrf.mxu1  ;;  %v3922_v33 = vpop.f32.mrf.mxu0 }
 0x340   :  { %3335 = vst [vmem:[%s5995_s2 + $0x2e8] sm:$0xff] %v3223_v39 }
 0x341   :  { %v2810_v57 = vpop.f32.mrf.mxu1  ;;  %v3227_v44 = vpop.f32.mrf.mxu0 }
 0x342   :  { %v3228_v31 = vadd.f32 %v3227_v44, %v2803_v51  ;;  %v2811_v28 = vadd.f32 %v2810_v57, %v6095_v48 }
 0x343   :  { %v2812_v24 = vpop.f32.mrf.mxu1  ;;  %v3925_v41 = vpop.f32.mrf.mxu0 }
 0x344   :  { %3336 = vst [vmem:[%s5995_s2 + $0x2f0] sm:$0xff] %v3228_v31 }
 0x345   :  { %v2813_v58 = vpop.f32.mrf.mxu1  ;;  %v3230_v54 = vpop.f32.mrf.mxu0 }
 0x346   :  { %v3231_v45 = vadd.f32 %v3230_v54, %v2806_v21  ;;  %v2814_v14 = vadd.f32 %v2813_v58, %v6096_v27 }
 0x347   :  { %v3926_v19 = vpop.f32.mrf.mxu0  ;;  %v2815_v55 = vpop.f32.mrf.mxu1 }
 0x348   :  { %3337 = vst [vmem:[%s5995_s2 + $0x2f8] sm:$0xff] %v3231_v45 }
 0x349   :  { %v3235_v3 = vpop.f32.mrf.mxu0 }
 0x34a   :  { %v3236_v42 = vadd.f32 %v3235_v3, %v2811_v28 }
 0x34b   :  { %v3929_v61 = vpop.f32.mrf.mxu0 }
 0x34c   :  { %3338 = vst [vmem:[%s5995_s2 + $0x300] sm:$0xff] %v3236_v42 }
 0x34d   :  { %v3238_v60 = vpop.f32.mrf.mxu0 }
 0x34e   :  { %v3239_v17 = vadd.f32 %v3238_v60, %v2814_v14 }
 0x34f   :  { %v3930_v26 = vpop.f32.mrf.mxu0 }
 0x350   :  { %3339 = vst [vmem:[%s5995_s2 + $0x308] sm:$0xff] %v3239_v17 }

</bundles_post_ra>
